<compile_context>
chip_gen: v7x
topology: tpu7x:2x2x1
jax: 0.10.0
libtpu: 0.0.40
codegen_flags: <defaults>
</compile_context>

<pallas_src>
import jax
import jax.numpy as jnp
from jax.experimental import pallas as pl
from jax.experimental.pallas import tpu as pltpu


# --------------------- fused maxpool + conv1 + conv2 kernel ------------------

def _disc_fused_kernel(x_ref, w1_ref, sb1_ref, w2_ref, sb2_ref, o_ref,
                       pad1_ref, pat1_ref, pad2_ref, pat2_ref):
    # x_ref:   (1, Ho, 2, Wo, 2, Cin)   pre-split 2x2 windows, NHWC channels-last
    # w1_ref:  (9*Cin,  Cmid) bf16      conv1 weights, tap-major (dy*3+dx, ci)
    # sb1_ref: (2, Cmid) f32            row 0 = fused BN scale, row 1 = fused bias
    # w2_ref:  (9*Cmid, Cout) bf16
    # sb2_ref: (2, Cout) f32
    # o_ref:   (1, Ho*Wo, Cout)
    # pad1/pad2: zero-padded activation maps (VMEM scratch, f32)
    # pat1/pat2: im2col patch matrices    (VMEM scratch, bf16)
    _, ho, _, wo, _, cin = x_ref.shape
    cmid = pad2_ref.shape[-1]
    hw = ho * wo

    # ---- MaxPool2d(2): 4 static-slice loads + elementwise max (VPU) ----
    x00 = x_ref[0, :, 0, :, 0, :]
    x01 = x_ref[0, :, 0, :, 1, :]
    x10 = x_ref[0, :, 1, :, 0, :]
    x11 = x_ref[0, :, 1, :, 1, :]
    pooled = jnp.maximum(jnp.maximum(x00, x01), jnp.maximum(x10, x11))

    # ---- conv1: in-kernel zero-pad + im2col + ONE long-K MXU matmul ----
    pad1_ref[...] = jnp.zeros_like(pad1_ref)
    pad1_ref[1:ho + 1, 1:wo + 1, :] = pooled
    for t in range(9):                        # static unroll: 9 VMEM slice copies
        dy, dx = t // 3, t % 3
        tile = pad1_ref[dy:dy + ho, dx:dx + wo, :]          # (Ho, Wo, Cin)
        pat1_ref[:, t * cin:(t + 1) * cin] = (
            tile.reshape(hw, cin).astype(pat1_ref.dtype))
    y1 = jnp.dot(pat1_ref[...], w1_ref[...],
                 preferred_element_type=jnp.float32)        # (HW, Cmid)
    y1 = jnp.maximum(y1 * sb1_ref[0:1, :] + sb1_ref[1:2, :], 0.0)

    # ---- conv2: same structure, fed directly from VMEM (no HBM round-trip) ----
    pad2_ref[...] = jnp.zeros_like(pad2_ref)
    pad2_ref[1:ho + 1, 1:wo + 1, :] = y1.reshape(ho, wo, cmid)
    for t in range(9):
        dy, dx = t // 3, t % 3
        tile = pad2_ref[dy:dy + ho, dx:dx + wo, :]          # (Ho, Wo, Cmid)
        pat2_ref[:, t * cmid:(t + 1) * cmid] = (
            tile.reshape(hw, cmid).astype(pat2_ref.dtype))
    y2 = jnp.dot(pat2_ref[...], w2_ref[...],
                 preferred_element_type=jnp.float32)        # (HW, Cout)
    y2 = jnp.maximum(y2 * sb2_ref[0:1, :] + sb2_ref[1:2, :], 0.0)

    o_ref[0] = y2.astype(o_ref.dtype)


def down_block(x_nchw, w1, s1, b1, w2, s2, b2):
    # x_nchw: (N, Cin, H, W). Returns (N, Cout, H//2, W//2).
    n, cin, h, w = x_nchw.shape
    ho, wo = h // 2, w // 2
    hw = ho * wo
    cmid = w1.shape[-1]
    cout = w2.shape[-1]

    # NCHW -> NHWC and split H,W into (Ho,2,Wo,2) so the kernel does the 2x2
    # pool with plain static slices (wrapper-side layout plumbing only).
    x = jnp.transpose(x_nchw, (0, 2, 3, 1)).reshape(n, ho, 2, wo, 2, cin)

    w1f = w1.reshape(9 * cin, cmid).astype(jnp.bfloat16)    # tap-major K
    w2f = w2.reshape(9 * cmid, cout).astype(jnp.bfloat16)
    sb1 = jnp.stack([s1, b1], axis=0).astype(jnp.float32)   # (2, Cmid)
    sb2 = jnp.stack([s2, b2], axis=0).astype(jnp.float32)   # (2, Cout)

    out = pl.pallas_call(
        _disc_fused_kernel,
        out_shape=jax.ShapeDtypeStruct((n, hw, cout), x_nchw.dtype),
        grid=(n,),
        in_specs=[
            pl.BlockSpec((1, ho, 2, wo, 2, cin), lambda i: (i, 0, 0, 0, 0, 0)),
            pl.BlockSpec((9 * cin, cmid), lambda i: (0, 0)),   # VMEM-resident
            pl.BlockSpec((2, cmid), lambda i: (0, 0)),
            pl.BlockSpec((9 * cmid, cout), lambda i: (0, 0)),
            pl.BlockSpec((2, cout), lambda i: (0, 0)),
        ],
        out_specs=pl.BlockSpec((1, hw, cout), lambda i: (i, 0, 0)),
        scratch_shapes=[
            pltpu.VMEM((ho + 2, wo + 2, cin), jnp.float32),    # padded pooled map
            pltpu.VMEM((hw, 9 * cin), jnp.bfloat16),           # im2col for conv1
            pltpu.VMEM((ho + 2, wo + 2, cmid), jnp.float32),   # padded conv1 out
            pltpu.VMEM((hw, 9 * cmid), jnp.bfloat16),          # im2col for conv2
        ],
        compiler_params=pltpu.CompilerParams(
            dimension_semantics=("parallel",)),
    )(x, w1f, sb1, w2f, sb2)

    out = out.reshape(n, ho, wo, cout)
    return jnp.transpose(out, (0, 3, 1, 2))                  # -> NCHW


# ------------------------------ parameters ----------------------------------

def init_params(key, cin=64, cmid=128, cout=128):
    k1, k2, k3, k4 = jax.random.split(key, 4)
    w1 = jax.random.normal(k1, (3, 3, cin, cmid), jnp.float32) / jnp.sqrt(9.0 * cin)
    b1 = jax.random.normal(k2, (cmid,), jnp.float32) * 0.01
    w2 = jax.random.normal(k3, (3, 3, cmid, cout), jnp.float32) / jnp.sqrt(9.0 * cmid)
    b2 = jax.random.normal(k4, (cout,), jnp.float32) * 0.01

    # TODO(synk): BatchNorm2d is applied in eval mode with default running
    # stats (mean=0, var=1, gamma=1, beta=0); training-mode batch statistics
    # are not implemented. Plug real running stats into fuse_bn for a trained
    # PyTorch checkpoint.
    eps = 1e-5

    def fuse_bn(gamma, beta, mean, var, conv_bias):
        s = gamma / jnp.sqrt(var + eps)
        return s, beta + s * (conv_bias - mean)

    s1, fb1 = fuse_bn(jnp.ones(cmid), jnp.zeros(cmid),
                      jnp.zeros(cmid), jnp.ones(cmid), b1)
    s2, fb2 = fuse_bn(jnp.ones(cout), jnp.zeros(cout),
                      jnp.zeros(cout), jnp.ones(cout), b2)
    return dict(w1=w1, s1=s1, b1=fb1, w2=w2, s2=s2, b2=fb2)


# ------------------------------ forward --------------------------------------

def discriminator_forward(params, x_nchw):
    # x_nchw: (N, 64, H, W), matching the PyTorch module's input convention.
    x = down_block(x_nchw,
                   params["w1"], params["s1"], params["b1"],
                   params["w2"], params["s2"], params["b2"])
    mu = None
    log_var = None
    z = None
    return (x, z, mu, log_var)


def _reference_forward(params, x_nchw):
    # Plain-JAX f32 reference (NHWC convs) to sanity-check the Pallas path.
    x = jnp.transpose(x_nchw, (0, 2, 3, 1))
    n, h, w, c = x.shape
    x = jnp.max(x.reshape(n, h // 2, 2, w // 2, 2, c), axis=(2, 4))

    def conv(x, w_hwio, scale, bias):
        y = jax.lax.conv_general_dilated(
            x, w_hwio, window_strides=(1, 1), padding="SAME",
            dimension_numbers=("NHWC", "HWIO", "NHWC"))
        return jnp.maximum(y * scale + bias, 0.0)

    x = conv(x, params["w1"], params["s1"], params["b1"])
    x = conv(x, params["w2"], params["s2"], params["b2"])
    return jnp.transpose(x, (0, 3, 1, 2))


if __name__ == "__main__":
    key = jax.random.PRNGKey(0)
    kx, kp = jax.random.split(key)
    # PyTorch-convention input: N=2, C=64 (required by Down(64,128)), H=W=16.
    x = jax.random.normal(kx, (2, 64, 16, 16), jnp.float32)
    params = init_params(kp)

    out, z, mu, log_var = discriminator_forward(params, x)
    out = jax.block_until_ready(out)

    assert out.shape == (2, 128, 8, 8), out.shape
    assert z is None and mu is None and log_var is None

    ref = jax.block_until_ready(_reference_forward(params, x))
    assert jnp.allclose(out, ref, atol=2e-2, rtol=2e-2), \
        float(jnp.max(jnp.abs(out - ref)))

    print("KERNEL_OK")
</pallas_src>

<mosaic_0001>
module attributes {stable_mosaic.version = 11 : i64} {
  func.func @_disc_fused_kernel(%arg0: i32, %arg1: memref<1x8x2x8x2x64xf32, #tpu.memory_space<vmem>>, %arg2: memref<576x128xbf16, #tpu.memory_space<vmem>>, %arg3: memref<2x128xf32, #tpu.memory_space<vmem>>, %arg4: memref<1152x128xbf16, #tpu.memory_space<vmem>>, %arg5: memref<2x128xf32, #tpu.memory_space<vmem>>, %arg6: memref<1x64x128xf32, #tpu.memory_space<vmem>>, %arg7: memref<10x10x64xf32, #tpu.memory_space<vmem>>, %arg8: memref<64x576xbf16, #tpu.memory_space<vmem>>, %arg9: memref<10x10x128xf32, #tpu.memory_space<vmem>>, %arg10: memref<64x1152xbf16, #tpu.memory_space<vmem>>) attributes {dimension_semantics = [#tpu.dimension_semantics<parallel>], iteration_bounds = array<i64: 2>, scalar_prefetch = 0 : i64, scratch_operands = 4 : i64, tpu.core_type = #tpu.core_type<tc>, window_params = [{transform_indices = @transform_0, window_bounds = array<i64: 1, 8, 2, 8, 2, 64>}, {pipeline_mode = #tpu.pipeline_mode<synchronous>, transform_indices = @transform_1, window_bounds = array<i64: 576, 128>}, {pipeline_mode = #tpu.pipeline_mode<synchronous>, transform_indices = @transform_2, window_bounds = array<i64: 2, 128>}, {pipeline_mode = #tpu.pipeline_mode<synchronous>, transform_indices = @transform_3, window_bounds = array<i64: 1152, 128>}, {pipeline_mode = #tpu.pipeline_mode<synchronous>, transform_indices = @transform_4, window_bounds = array<i64: 2, 128>}, {transform_indices = @transform_5, window_bounds = array<i64: 1, 64, 128>}]} {
    %c0 = arith.constant 0 : index
    %c0_0 = arith.constant 0 : index
    %c0_1 = arith.constant 0 : index
    %c0_2 = arith.constant 0 : index
    %c0_3 = arith.constant 0 : index
    %c0_4 = arith.constant 0 : index
    %0 = vector.load %arg1[%c0, %c0_0, %c0_1, %c0_2, %c0_3, %c0_4] : memref<1x8x2x8x2x64xf32, #tpu.memory_space<vmem>>, vector<1x8x1x8x1x64xf32>
    %1 = vector.shape_cast %0 : vector<1x8x1x8x1x64xf32> to vector<8x8x64xf32>
    %c0_5 = arith.constant 0 : index
    %c0_6 = arith.constant 0 : index
    %c0_7 = arith.constant 0 : index
    %c0_8 = arith.constant 0 : index
    %c1 = arith.constant 1 : index
    %c0_9 = arith.constant 0 : index
    %2 = vector.load %arg1[%c0_5, %c0_6, %c0_7, %c0_8, %c1, %c0_9] : memref<1x8x2x8x2x64xf32, #tpu.memory_space<vmem>>, vector<1x8x1x8x1x64xf32>
    %3 = vector.shape_cast %2 : vector<1x8x1x8x1x64xf32> to vector<8x8x64xf32>
    %c0_10 = arith.constant 0 : index
    %c0_11 = arith.constant 0 : index
    %c1_12 = arith.constant 1 : index
    %c0_13 = arith.constant 0 : index
    %c0_14 = arith.constant 0 : index
    %c0_15 = arith.constant 0 : index
    %4 = vector.load %arg1[%c0_10, %c0_11, %c1_12, %c0_13, %c0_14, %c0_15] : memref<1x8x2x8x2x64xf32, #tpu.memory_space<vmem>>, vector<1x8x1x8x1x64xf32>
    %5 = vector.shape_cast %4 : vector<1x8x1x8x1x64xf32> to vector<8x8x64xf32>
    %c0_16 = arith.constant 0 : index
    %c0_17 = arith.constant 0 : index
    %c1_18 = arith.constant 1 : index
    %c0_19 = arith.constant 0 : index
    %c1_20 = arith.constant 1 : index
    %c0_21 = arith.constant 0 : index
    %6 = vector.load %arg1[%c0_16, %c0_17, %c1_18, %c0_19, %c1_20, %c0_21] : memref<1x8x2x8x2x64xf32, #tpu.memory_space<vmem>>, vector<1x8x1x8x1x64xf32>
    %7 = vector.shape_cast %6 : vector<1x8x1x8x1x64xf32> to vector<8x8x64xf32>
    %8 = arith.maximumf %1, %3 : vector<8x8x64xf32>
    %9 = arith.maximumf %5, %7 : vector<8x8x64xf32>
    %10 = arith.maximumf %8, %9 : vector<8x8x64xf32>
    %cst = arith.constant 0.000000e+00 : f32
    %11 = vector.broadcast %cst : f32 to vector<10x10x64xf32>
    %c0_22 = arith.constant 0 : index
    %c0_23 = arith.constant 0 : index
    %c0_24 = arith.constant 0 : index
    %12 = vector.load %arg7[%c0_22, %c0_23, %c0_24] : memref<10x10x64xf32, #tpu.memory_space<vmem>>, vector<10x10x64xf32>
    tpu.vector_store %arg7[%c0_22, %c0_23, %c0_24], %11 {strides = array<i32>} : memref<10x10x64xf32, #tpu.memory_space<vmem>>, vector<10x10x64xf32>,
    %c1_25 = arith.constant 1 : index
    %c1_26 = arith.constant 1 : index
    %c0_27 = arith.constant 0 : index
    %13 = vector.load %arg7[%c1_25, %c1_26, %c0_27] : memref<10x10x64xf32, #tpu.memory_space<vmem>>, vector<8x8x64xf32>
    tpu.vector_store %arg7[%c1_25, %c1_26, %c0_27], %10 {strides = array<i32>} : memref<10x10x64xf32, #tpu.memory_space<vmem>>, vector<8x8x64xf32>,
    %c0_28 = arith.constant 0 : index
    %c0_29 = arith.constant 0 : index
    %c0_30 = arith.constant 0 : index
    %14 = vector.load %arg7[%c0_28, %c0_29, %c0_30] : memref<10x10x64xf32, #tpu.memory_space<vmem>>, vector<8x8x64xf32>
    %15 = vector.shape_cast %14 : vector<8x8x64xf32> to vector<64x64xf32>
    %16 = arith.truncf %15 : vector<64x64xf32> to vector<64x64xbf16>
    %c0_31 = arith.constant 0 : index
    %c0_32 = arith.constant 0 : index
    %17 = vector.load %arg8[%c0_31, %c0_32] : memref<64x576xbf16, #tpu.memory_space<vmem>>, vector<64x64xbf16>
    tpu.vector_store %arg8[%c0_31, %c0_32], %16 {strides = array<i32>} : memref<64x576xbf16, #tpu.memory_space<vmem>>, vector<64x64xbf16>,
    %c0_33 = arith.constant 0 : index
    %c1_34 = arith.constant 1 : index
    %c0_35 = arith.constant 0 : index
    %18 = vector.load %arg7[%c0_33, %c1_34, %c0_35] : memref<10x10x64xf32, #tpu.memory_space<vmem>>, vector<8x8x64xf32>
    %19 = vector.shape_cast %18 : vector<8x8x64xf32> to vector<64x64xf32>
    %20 = arith.truncf %19 : vector<64x64xf32> to vector<64x64xbf16>
    %c0_36 = arith.constant 0 : index
    %c64 = arith.constant 64 : index
    %21 = vector.load %arg8[%c0_36, %c64] : memref<64x576xbf16, #tpu.memory_space<vmem>>, vector<64x64xbf16>
    tpu.vector_store %arg8[%c0_36, %c64], %20 {strides = array<i32>} : memref<64x576xbf16, #tpu.memory_space<vmem>>, vector<64x64xbf16>,
    %c0_37 = arith.constant 0 : index
    %c2 = arith.constant 2 : index
    %c0_38 = arith.constant 0 : index
    %22 = vector.load %arg7[%c0_37, %c2, %c0_38] : memref<10x10x64xf32, #tpu.memory_space<vmem>>, vector<8x8x64xf32>
    %23 = vector.shape_cast %22 : vector<8x8x64xf32> to vector<64x64xf32>
    %24 = arith.truncf %23 : vector<64x64xf32> to vector<64x64xbf16>
    %c0_39 = arith.constant 0 : index
    %c128 = arith.constant 128 : index
    %25 = vector.load %arg8[%c0_39, %c128] : memref<64x576xbf16, #tpu.memory_space<vmem>>, vector<64x64xbf16>
    tpu.vector_store %arg8[%c0_39, %c128], %24 {strides = array<i32>} : memref<64x576xbf16, #tpu.memory_space<vmem>>, vector<64x64xbf16>,
    %c1_40 = arith.constant 1 : index
    %c0_41 = arith.constant 0 : index
    %c0_42 = arith.constant 0 : index
    %26 = vector.load %arg7[%c1_40, %c0_41, %c0_42] : memref<10x10x64xf32, #tpu.memory_space<vmem>>, vector<8x8x64xf32>
    %27 = vector.shape_cast %26 : vector<8x8x64xf32> to vector<64x64xf32>
    %28 = arith.truncf %27 : vector<64x64xf32> to vector<64x64xbf16>
    %c0_43 = arith.constant 0 : index
    %c192 = arith.constant 192 : index
    %29 = vector.load %arg8[%c0_43, %c192] : memref<64x576xbf16, #tpu.memory_space<vmem>>, vector<64x64xbf16>
    tpu.vector_store %arg8[%c0_43, %c192], %28 {strides = array<i32>} : memref<64x576xbf16, #tpu.memory_space<vmem>>, vector<64x64xbf16>,
    %c1_44 = arith.constant 1 : index
    %c1_45 = arith.constant 1 : index
    %c0_46 = arith.constant 0 : index
    %30 = vector.load %arg7[%c1_44, %c1_45, %c0_46] : memref<10x10x64xf32, #tpu.memory_space<vmem>>, vector<8x8x64xf32>
    %31 = vector.shape_cast %30 : vector<8x8x64xf32> to vector<64x64xf32>
    %32 = arith.truncf %31 : vector<64x64xf32> to vector<64x64xbf16>
    %c0_47 = arith.constant 0 : index
    %c256 = arith.constant 256 : index
    %33 = vector.load %arg8[%c0_47, %c256] : memref<64x576xbf16, #tpu.memory_space<vmem>>, vector<64x64xbf16>
    tpu.vector_store %arg8[%c0_47, %c256], %32 {strides = array<i32>} : memref<64x576xbf16, #tpu.memory_space<vmem>>, vector<64x64xbf16>,
    %c1_48 = arith.constant 1 : index
    %c2_49 = arith.constant 2 : index
    %c0_50 = arith.constant 0 : index
    %34 = vector.load %arg7[%c1_48, %c2_49, %c0_50] : memref<10x10x64xf32, #tpu.memory_space<vmem>>, vector<8x8x64xf32>
    %35 = vector.shape_cast %34 : vector<8x8x64xf32> to vector<64x64xf32>
    %36 = arith.truncf %35 : vector<64x64xf32> to vector<64x64xbf16>
    %c0_51 = arith.constant 0 : index
    %c320 = arith.constant 320 : index
    %37 = vector.load %arg8[%c0_51, %c320] : memref<64x576xbf16, #tpu.memory_space<vmem>>, vector<64x64xbf16>
    tpu.vector_store %arg8[%c0_51, %c320], %36 {strides = array<i32>} : memref<64x576xbf16, #tpu.memory_space<vmem>>, vector<64x64xbf16>,
    %c2_52 = arith.constant 2 : index
    %c0_53 = arith.constant 0 : index
    %c0_54 = arith.constant 0 : index
    %38 = vector.load %arg7[%c2_52, %c0_53, %c0_54] : memref<10x10x64xf32, #tpu.memory_space<vmem>>, vector<8x8x64xf32>
    %39 = vector.shape_cast %38 : vector<8x8x64xf32> to vector<64x64xf32>
    %40 = arith.truncf %39 : vector<64x64xf32> to vector<64x64xbf16>
    %c0_55 = arith.constant 0 : index
    %c384 = arith.constant 384 : index
    %41 = vector.load %arg8[%c0_55, %c384] : memref<64x576xbf16, #tpu.memory_space<vmem>>, vector<64x64xbf16>
    tpu.vector_store %arg8[%c0_55, %c384], %40 {strides = array<i32>} : memref<64x576xbf16, #tpu.memory_space<vmem>>, vector<64x64xbf16>,
    %c2_56 = arith.constant 2 : index
    %c1_57 = arith.constant 1 : index
    %c0_58 = arith.constant 0 : index
    %42 = vector.load %arg7[%c2_56, %c1_57, %c0_58] : memref<10x10x64xf32, #tpu.memory_space<vmem>>, vector<8x8x64xf32>
    %43 = vector.shape_cast %42 : vector<8x8x64xf32> to vector<64x64xf32>
    %44 = arith.truncf %43 : vector<64x64xf32> to vector<64x64xbf16>
    %c0_59 = arith.constant 0 : index
    %c448 = arith.constant 448 : index
    %45 = vector.load %arg8[%c0_59, %c448] : memref<64x576xbf16, #tpu.memory_space<vmem>>, vector<64x64xbf16>
    tpu.vector_store %arg8[%c0_59, %c448], %44 {strides = array<i32>} : memref<64x576xbf16, #tpu.memory_space<vmem>>, vector<64x64xbf16>,
    %c2_60 = arith.constant 2 : index
    %c2_61 = arith.constant 2 : index
    %c0_62 = arith.constant 0 : index
    %46 = vector.load %arg7[%c2_60, %c2_61, %c0_62] : memref<10x10x64xf32, #tpu.memory_space<vmem>>, vector<8x8x64xf32>
    %47 = vector.shape_cast %46 : vector<8x8x64xf32> to vector<64x64xf32>
    %48 = arith.truncf %47 : vector<64x64xf32> to vector<64x64xbf16>
    %c0_63 = arith.constant 0 : index
    %c512 = arith.constant 512 : index
    %49 = vector.load %arg8[%c0_63, %c512] : memref<64x576xbf16, #tpu.memory_space<vmem>>, vector<64x64xbf16>
    tpu.vector_store %arg8[%c0_63, %c512], %48 {strides = array<i32>} : memref<64x576xbf16, #tpu.memory_space<vmem>>, vector<64x64xbf16>,
    %c0_64 = arith.constant 0 : index
    %c0_65 = arith.constant 0 : index
    %50 = vector.load %arg8[%c0_64, %c0_65] : memref<64x576xbf16, #tpu.memory_space<vmem>>, vector<64x576xbf16>
    %c0_66 = arith.constant 0 : index
    %c0_67 = arith.constant 0 : index
    %51 = vector.load %arg2[%c0_66, %c0_67] : memref<576x128xbf16, #tpu.memory_space<vmem>>, vector<576x128xbf16>
    %cst_68 = arith.constant dense<0.000000e+00> : vector<64x128xf32>
    %52 = tpu.matmul %50, %51, %cst_68 {dimension_numbers = #tpu.dot_dimension_numbers<[1], [0], [0], [1], [0, 0, 1, 1], [], []>} : vector<64x576xbf16>, vector<576x128xbf16>, vector<64x128xf32> -> vector<64x128xf32>
    %c0_69 = arith.constant 0 : index
    %c0_70 = arith.constant 0 : index
    %53 = vector.load %arg3[%c0_69, %c0_70] : memref<2x128xf32, #tpu.memory_space<vmem>>, vector<1x128xf32>
    %54 = vector.broadcast %53 : vector<1x128xf32> to vector<64x128xf32>
    %55 = arith.mulf %52, %54 : vector<64x128xf32>
    %c1_71 = arith.constant 1 : index
    %c0_72 = arith.constant 0 : index
    %56 = vector.load %arg3[%c1_71, %c0_72] : memref<2x128xf32, #tpu.memory_space<vmem>>, vector<1x128xf32>
    %57 = vector.broadcast %56 : vector<1x128xf32> to vector<64x128xf32>
    %58 = arith.addf %55, %57 : vector<64x128xf32>
    %cst_73 = arith.constant 0.000000e+00 : f32
    %59 = vector.broadcast %cst_73 : f32 to vector<64x128xf32>
    %60 = arith.maximumf %58, %59 : vector<64x128xf32>
    %cst_74 = arith.constant 0.000000e+00 : f32
    %61 = vector.broadcast %cst_74 : f32 to vector<10x10x128xf32>
    %c0_75 = arith.constant 0 : index
    %c0_76 = arith.constant 0 : index
    %c0_77 = arith.constant 0 : index
    %62 = vector.load %arg9[%c0_75, %c0_76, %c0_77] : memref<10x10x128xf32, #tpu.memory_space<vmem>>, vector<10x10x128xf32>
    tpu.vector_store %arg9[%c0_75, %c0_76, %c0_77], %61 {strides = array<i32>} : memref<10x10x128xf32, #tpu.memory_space<vmem>>, vector<10x10x128xf32>,
    %63 = vector.shape_cast %60 : vector<64x128xf32> to vector<8x8x128xf32>
    %c1_78 = arith.constant 1 : index
    %c1_79 = arith.constant 1 : index
    %c0_80 = arith.constant 0 : index
    %64 = vector.load %arg9[%c1_78, %c1_79, %c0_80] : memref<10x10x128xf32, #tpu.memory_space<vmem>>, vector<8x8x128xf32>
    tpu.vector_store %arg9[%c1_78, %c1_79, %c0_80], %63 {strides = array<i32>} : memref<10x10x128xf32, #tpu.memory_space<vmem>>, vector<8x8x128xf32>,
    %c0_81 = arith.constant 0 : index
    %c0_82 = arith.constant 0 : index
    %c0_83 = arith.constant 0 : index
    %65 = vector.load %arg9[%c0_81, %c0_82, %c0_83] : memref<10x10x128xf32, #tpu.memory_space<vmem>>, vector<8x8x128xf32>
    %66 = vector.shape_cast %65 : vector<8x8x128xf32> to vector<64x128xf32>
    %67 = arith.truncf %66 : vector<64x128xf32> to vector<64x128xbf16>
    %c0_84 = arith.constant 0 : index
    %c0_85 = arith.constant 0 : index
    %68 = vector.load %arg10[%c0_84, %c0_85] : memref<64x1152xbf16, #tpu.memory_space<vmem>>, vector<64x128xbf16>
    tpu.vector_store %arg10[%c0_84, %c0_85], %67 {strides = array<i32>} : memref<64x1152xbf16, #tpu.memory_space<vmem>>, vector<64x128xbf16>,
    %c0_86 = arith.constant 0 : index
    %c1_87 = arith.constant 1 : index
    %c0_88 = arith.constant 0 : index
    %69 = vector.load %arg9[%c0_86, %c1_87, %c0_88] : memref<10x10x128xf32, #tpu.memory_space<vmem>>, vector<8x8x128xf32>
    %70 = vector.shape_cast %69 : vector<8x8x128xf32> to vector<64x128xf32>
    %71 = arith.truncf %70 : vector<64x128xf32> to vector<64x128xbf16>
    %c0_89 = arith.constant 0 : index
    %c128_90 = arith.constant 128 : index
    %72 = vector.load %arg10[%c0_89, %c128_90] : memref<64x1152xbf16, #tpu.memory_space<vmem>>, vector<64x128xbf16>
    tpu.vector_store %arg10[%c0_89, %c128_90], %71 {strides = array<i32>} : memref<64x1152xbf16, #tpu.memory_space<vmem>>, vector<64x128xbf16>,
    %c0_91 = arith.constant 0 : index
    %c2_92 = arith.constant 2 : index
    %c0_93 = arith.constant 0 : index
    %73 = vector.load %arg9[%c0_91, %c2_92, %c0_93] : memref<10x10x128xf32, #tpu.memory_space<vmem>>, vector<8x8x128xf32>
    %74 = vector.shape_cast %73 : vector<8x8x128xf32> to vector<64x128xf32>
    %75 = arith.truncf %74 : vector<64x128xf32> to vector<64x128xbf16>
    %c0_94 = arith.constant 0 : index
    %c256_95 = arith.constant 256 : index
    %76 = vector.load %arg10[%c0_94, %c256_95] : memref<64x1152xbf16, #tpu.memory_space<vmem>>, vector<64x128xbf16>
    tpu.vector_store %arg10[%c0_94, %c256_95], %75 {strides = array<i32>} : memref<64x1152xbf16, #tpu.memory_space<vmem>>, vector<64x128xbf16>,
    %c1_96 = arith.constant 1 : index
    %c0_97 = arith.constant 0 : index
    %c0_98 = arith.constant 0 : index
    %77 = vector.load %arg9[%c1_96, %c0_97, %c0_98] : memref<10x10x128xf32, #tpu.memory_space<vmem>>, vector<8x8x128xf32>
    %78 = vector.shape_cast %77 : vector<8x8x128xf32> to vector<64x128xf32>
    %79 = arith.truncf %78 : vector<64x128xf32> to vector<64x128xbf16>
    %c0_99 = arith.constant 0 : index
    %c384_100 = arith.constant 384 : index
    %80 = vector.load %arg10[%c0_99, %c384_100] : memref<64x1152xbf16, #tpu.memory_space<vmem>>, vector<64x128xbf16>
    tpu.vector_store %arg10[%c0_99, %c384_100], %79 {strides = array<i32>} : memref<64x1152xbf16, #tpu.memory_space<vmem>>, vector<64x128xbf16>,
    %c1_101 = arith.constant 1 : index
    %c1_102 = arith.constant 1 : index
    %c0_103 = arith.constant 0 : index
    %81 = vector.load %arg9[%c1_101, %c1_102, %c0_103] : memref<10x10x128xf32, #tpu.memory_space<vmem>>, vector<8x8x128xf32>
    %82 = vector.shape_cast %81 : vector<8x8x128xf32> to vector<64x128xf32>
    %83 = arith.truncf %82 : vector<64x128xf32> to vector<64x128xbf16>
    %c0_104 = arith.constant 0 : index
    %c512_105 = arith.constant 512 : index
    %84 = vector.load %arg10[%c0_104, %c512_105] : memref<64x1152xbf16, #tpu.memory_space<vmem>>, vector<64x128xbf16>
    tpu.vector_store %arg10[%c0_104, %c512_105], %83 {strides = array<i32>} : memref<64x1152xbf16, #tpu.memory_space<vmem>>, vector<64x128xbf16>,
    %c1_106 = arith.constant 1 : index
    %c2_107 = arith.constant 2 : index
    %c0_108 = arith.constant 0 : index
    %85 = vector.load %arg9[%c1_106, %c2_107, %c0_108] : memref<10x10x128xf32, #tpu.memory_space<vmem>>, vector<8x8x128xf32>
    %86 = vector.shape_cast %85 : vector<8x8x128xf32> to vector<64x128xf32>
    %87 = arith.truncf %86 : vector<64x128xf32> to vector<64x128xbf16>
    %c0_109 = arith.constant 0 : index
    %c640 = arith.constant 640 : index
    %88 = vector.load %arg10[%c0_109, %c640] : memref<64x1152xbf16, #tpu.memory_space<vmem>>, vector<64x128xbf16>
    tpu.vector_store %arg10[%c0_109, %c640], %87 {strides = array<i32>} : memref<64x1152xbf16, #tpu.memory_space<vmem>>, vector<64x128xbf16>,
    %c2_110 = arith.constant 2 : index
    %c0_111 = arith.constant 0 : index
    %c0_112 = arith.constant 0 : index
    %89 = vector.load %arg9[%c2_110, %c0_111, %c0_112] : memref<10x10x128xf32, #tpu.memory_space<vmem>>, vector<8x8x128xf32>
    %90 = vector.shape_cast %89 : vector<8x8x128xf32> to vector<64x128xf32>
    %91 = arith.truncf %90 : vector<64x128xf32> to vector<64x128xbf16>
    %c0_113 = arith.constant 0 : index
    %c768 = arith.constant 768 : index
    %92 = vector.load %arg10[%c0_113, %c768] : memref<64x1152xbf16, #tpu.memory_space<vmem>>, vector<64x128xbf16>
    tpu.vector_store %arg10[%c0_113, %c768], %91 {strides = array<i32>} : memref<64x1152xbf16, #tpu.memory_space<vmem>>, vector<64x128xbf16>,
    %c2_114 = arith.constant 2 : index
    %c1_115 = arith.constant 1 : index
    %c0_116 = arith.constant 0 : index
    %93 = vector.load %arg9[%c2_114, %c1_115, %c0_116] : memref<10x10x128xf32, #tpu.memory_space<vmem>>, vector<8x8x128xf32>
    %94 = vector.shape_cast %93 : vector<8x8x128xf32> to vector<64x128xf32>
    %95 = arith.truncf %94 : vector<64x128xf32> to vector<64x128xbf16>
    %c0_117 = arith.constant 0 : index
    %c896 = arith.constant 896 : index
    %96 = vector.load %arg10[%c0_117, %c896] : memref<64x1152xbf16, #tpu.memory_space<vmem>>, vector<64x128xbf16>
    tpu.vector_store %arg10[%c0_117, %c896], %95 {strides = array<i32>} : memref<64x1152xbf16, #tpu.memory_space<vmem>>, vector<64x128xbf16>,
    %c2_118 = arith.constant 2 : index
    %c2_119 = arith.constant 2 : index
    %c0_120 = arith.constant 0 : index
    %97 = vector.load %arg9[%c2_118, %c2_119, %c0_120] : memref<10x10x128xf32, #tpu.memory_space<vmem>>, vector<8x8x128xf32>
    %98 = vector.shape_cast %97 : vector<8x8x128xf32> to vector<64x128xf32>
    %99 = arith.truncf %98 : vector<64x128xf32> to vector<64x128xbf16>
    %c0_121 = arith.constant 0 : index
    %c1024 = arith.constant 1024 : index
    %100 = vector.load %arg10[%c0_121, %c1024] : memref<64x1152xbf16, #tpu.memory_space<vmem>>, vector<64x128xbf16>
    tpu.vector_store %arg10[%c0_121, %c1024], %99 {strides = array<i32>} : memref<64x1152xbf16, #tpu.memory_space<vmem>>, vector<64x128xbf16>,
    %c0_122 = arith.constant 0 : index
    %c0_123 = arith.constant 0 : index
    %101 = vector.load %arg10[%c0_122, %c0_123] : memref<64x1152xbf16, #tpu.memory_space<vmem>>, vector<64x1152xbf16>
    %c0_124 = arith.constant 0 : index
    %c0_125 = arith.constant 0 : index
    %102 = vector.load %arg4[%c0_124, %c0_125] : memref<1152x128xbf16, #tpu.memory_space<vmem>>, vector<1152x128xbf16>
    %cst_126 = arith.constant dense<0.000000e+00> : vector<64x128xf32>
    %103 = tpu.matmul %101, %102, %cst_126 {dimension_numbers = #tpu.dot_dimension_numbers<[1], [0], [0], [1], [0, 0, 1, 1], [], []>} : vector<64x1152xbf16>, vector<1152x128xbf16>, vector<64x128xf32> -> vector<64x128xf32>
    %c0_127 = arith.constant 0 : index
    %c0_128 = arith.constant 0 : index
    %104 = vector.load %arg5[%c0_127, %c0_128] : memref<2x128xf32, #tpu.memory_space<vmem>>, vector<1x128xf32>
    %105 = vector.broadcast %104 : vector<1x128xf32> to vector<64x128xf32>
    %106 = arith.mulf %103, %105 : vector<64x128xf32>
    %c1_129 = arith.constant 1 : index
    %c0_130 = arith.constant 0 : index
    %107 = vector.load %arg5[%c1_129, %c0_130] : memref<2x128xf32, #tpu.memory_space<vmem>>, vector<1x128xf32>
    %108 = vector.broadcast %107 : vector<1x128xf32> to vector<64x128xf32>
    %109 = arith.addf %106, %108 : vector<64x128xf32>
    %cst_131 = arith.constant 0.000000e+00 : f32
    %110 = vector.broadcast %cst_131 : f32 to vector<64x128xf32>
    %111 = arith.maximumf %109, %110 : vector<64x128xf32>
    %c0_132 = arith.constant 0 : index
    %c0_133 = arith.constant 0 : index
    %c0_134 = arith.constant 0 : index
    %112 = vector.load %arg6[%c0_132, %c0_133, %c0_134] : memref<1x64x128xf32, #tpu.memory_space<vmem>>, vector<1x64x128xf32>
    %113 = vector.shape_cast %112 : vector<1x64x128xf32> to vector<64x128xf32>
    %114 = vector.shape_cast %111 : vector<64x128xf32> to vector<1x64x128xf32>
    tpu.vector_store %arg6[%c0_132, %c0_133, %c0_134], %114 {strides = array<i32>} : memref<1x64x128xf32, #tpu.memory_space<vmem>>, vector<1x64x128xf32>,
    return
  }
  func.func @transform_0(%arg0: i32) -> (i32, i32, i32, i32, i32, i32) {
    %c0_i32 = arith.constant 0 : i32
    %c0_i32_0 = arith.constant 0 : i32
    %c0_i32_1 = arith.constant 0 : i32
    %c0_i32_2 = arith.constant 0 : i32
    %c0_i32_3 = arith.constant 0 : i32
    %c0_i32_4 = arith.constant 0 : i32
    return %arg0, %c0_i32, %c0_i32_0, %c0_i32_1, %c0_i32_2, %c0_i32_3 : i32, i32, i32, i32, i32, i32
  }
  func.func @transform_1(%arg0: i32) -> (i32, i32) {
    %c0_i32 = arith.constant 0 : i32
    %c0_i32_0 = arith.constant 0 : i32
    %c0_i32_1 = arith.constant 0 : i32
    return %c0_i32, %c0_i32_0 : i32, i32
  }
  func.func @transform_2(%arg0: i32) -> (i32, i32) {
    %c0_i32 = arith.constant 0 : i32
    %c0_i32_0 = arith.constant 0 : i32
    %c0_i32_1 = arith.constant 0 : i32
    return %c0_i32, %c0_i32_0 : i32, i32
  }
  func.func @transform_3(%arg0: i32) -> (i32, i32) {
    %c0_i32 = arith.constant 0 : i32
    %c0_i32_0 = arith.constant 0 : i32
    %c0_i32_1 = arith.constant 0 : i32
    return %c0_i32, %c0_i32_0 : i32, i32
  }
  func.func @transform_4(%arg0: i32) -> (i32, i32) {
    %c0_i32 = arith.constant 0 : i32
    %c0_i32_0 = arith.constant 0 : i32
    %c0_i32_1 = arith.constant 0 : i32
    return %c0_i32, %c0_i32_0 : i32, i32
  }
  func.func @transform_5(%arg0: i32) -> (i32, i32, i32) {
    %c0_i32 = arith.constant 0 : i32
    %c0_i32_0 = arith.constant 0 : i32
    %c0_i32_1 = arith.constant 0 : i32
    return %arg0, %c0_i32, %c0_i32_0 : i32, i32, i32
  }
}

</mosaic_0001>

<bundles_post_ra>
// kernel: tpu_custom_call.1
= control target key start
LH: loop header
LB: loop body
LE: loop exit
PB: predicated region body
PF: predicated region fallthrough
CT: control target
= control target key end

     0   :  { %10 = vsyncpa [#allocation7], 0  ;;  %s5315_s0 = inlined_call_operand.hbm [shape: f32[2,8,2,8,2,64], index: 0, kind: input, shape index: {}]   ;;  %s5316_s1 = inlined_call_operand.hbm [shape: bf16[576,128], index: 1, kind: input, shape index: {}]   ;;  %s5317_s2 = inlined_call_operand.vmem [shape: f32[2,128], index: 2, kind: input, shape index: {}]   ;;  %s5318_s3 = inlined_call_operand.hbm [shape: bf16[1152,128], index: 3, kind: input, shape index: {}]   ;;  %s5319_s4 = inlined_call_operand.vmem [shape: f32[2,128], index: 4, kind: input, shape index: {}]   ;;  %s5320_s5 = inlined_call_operand.hbm [shape: f32[2,64,128], index: 5, kind: output, shape index: {}]  }
   0x1   :  { %12 = vsyncpa [#allocation7 + $0x1], 0 }
   0x2   :  { %13 = vsyncpa [#allocation10], 0 }
   0x3   :  { %14 = vsyncpa [#allocation8], 0 }
   0x4   :  { %16 = vsyncpa [#allocation8 + $0x1], 0  ;;  %s3910_s18 = smov 0   ;;  %s3912_s19 = smov 0  }
   0x5   :  { %s3914_s20 = smov 0   ;;  %s3916_s21 = smov 0  }
   0x6 LB: > { %s3931_s22 = sadd.s32 4294967295, %s3866_s21   ;;  %s2962_s23 = sadd.s32 4294967294, %s3866_s21   ;;  %s3866_s21 = sphi %s3916_s21, %s5354_s21   ;;  %s3862_s20 = sphi %s3914_s20, %s5353_s20   ;;  %s3858_s19 = sphi %s3912_s19, %s5352_s19   ;;  %s3854_s18 = sphi %s3910_s18, %s5351_s18  }
   0x7   : > { %p42_p0 = scmp.ne.s32.totalorder %s3858_s19, %s3854_s18  ;;  %p5321_p1 = scmp.eq.s32.totalorder %s3931_s22, 0 }
   0x8   : > { %p156_p3 = scmp.eq.s32.totalorder %s2962_s23, 1  ;;  %p2963_p5 = scmp.ge.s32.totalorder %s3866_s21, 1 }
   0x9   : > { %p3940_p4 = por %p5321_p1, %p42_p0  ;;  %p163_p7 = scmp.lt.s32.totalorder %s3866_s21, 3 }
   0xa   : > { %p3945_p6 = por %p156_p3, %p42_p0  ;;  %s3868_s27 = smov [#allocation9]  }
   0xb   : > { %s5327_s24 = scalar_select %p3940_p4, 1, 0 }
   0xc   : > { %s5328_s25 = scalar_select %p3945_p6, 1, 0 }
   0xd   : > { %p3950_p8 = pnand %p2963_p5, %p163_p7  ;;  %s175_s28 = sshll.u32 %s3868_s27, 4  ;;  %s3954_s28 = int_to_ptr.vmem [resolvable:$true] %s175_s28 }
   0xe   : > { %s3869_s30 = smov [#allocation11]   ;;  %s3710_s9 = scalar_lea.hbm %s5316_s1, 4608 }
   0xf   : > { %p3538_p9 = pneg %p3950_p8  ;;  %s191_s6 = sshll.u32 %s3869_s30, 4  ;;  %s3965_s6 = int_to_ptr.vmem [resolvable:$true] %s191_s6 }
  0x10   : > { %p3711_p12 = scmp.ne.s32.totalorder %s5316_s1, %s3710_s9  ;;  %p3717_p5 = scmp.lt.u32.totalorder %s3710_s9, %s5316_s1 }
  0x11   : > { %p3961_p11 = pnand %p3538_p9, %p5321_p1 }
  0x13   : > { %p3712_p13 = pneg %p3961_p11 }
  0x15   : > { %p3713_p0 = pnand %p3712_p13, %p3711_p12 }
  0x17   : > { %p3714_p3 = pneg %p3713_p0 }
  0x19   : > { %p3719_p7 = pnand %p3717_p5, %p3714_p3 }
  0x1b   : > { %3722 = shalt.err (!%p3719_p7)
}
  0x1c   : > { %s3723_s14 = scalar_lea.vmem %s3954_s28, 4608  ;;  %p3731_p2 = scmp.lt.s32.totalorder %s3954_s28, %s3954_s28 }
  0x1d   : > { %p3724_p9 = scmp.ne.s32.totalorder %s3954_s28, %s3723_s14  ;;  %p3732_p12 = scmp.lt.s32.totalorder %s3723_s14, %s3723_s14 }
  0x1f   : > { %p3726_p10 = pnand %p3724_p9, %p3712_p13  ;;  %p3733_p0 = por %p3732_p12, %p3731_p2 }
  0x21   : > { %p3727_p1 = pneg %p3726_p10 }
  0x23   : > { %p3734_p6 = pnand %p3733_p0, %p3727_p1 }
  0x25   : > { %3737 = shalt.err (!%p3734_p6)
}
  0x26   : > { %s3870_s15 = smov 64   ;;  %s3871_s16 = smov 4  }
  0x27   : > { %3541 = dma.hbm_to_vmem [thread:$0]  (!%p3961_p11), %s5316_s1, 4608, %s3954_s28, [#allocation10], %s3870_s15, %s3870_s15, %s3871_s16  }
  0x28   : > { %s3738_s7 = scalar_lea.hbm %s5318_s3, 9216 }
  0x29   : > { %p3739_p2 = scmp.ne.s32.totalorder %s5318_s3, %s3738_s7  ;;  %p3745_p10 = scmp.lt.u32.totalorder %s3738_s7, %s5318_s3 }
  0x2b   : > { %p3741_p1 = pnand %p3739_p2, %p3712_p13 }
  0x2d   : > { %p3742_p6 = pneg %p3741_p1 }
  0x2f   : > { %p3747_p3 = pnand %p3745_p10, %p3742_p6 }
  0x31   : > { %3750 = shalt.err (!%p3747_p3)
}
  0x32   : > { %s3751_s28 = scalar_lea.vmem %s3965_s6, 9216  ;;  %p3759_p12 = scmp.lt.s32.totalorder %s3965_s6, %s3965_s6 }
  0x33   : > { %p3752_p5 = scmp.ne.s32.totalorder %s3965_s6, %s3751_s28  ;;  %p3760_p0 = scmp.lt.s32.totalorder %s3751_s28, %s3751_s28 }
  0x35   : > { %p3754_p7 = pnand %p3752_p5, %p3712_p13  ;;  %p3761_p2 = por %p3760_p0, %p3759_p12 }
  0x37   : > { %p3755_p9 = pneg %p3754_p7 }
  0x39   : > { %p3762_p1 = pnand %p3761_p2, %p3755_p9 }
  0x3b   : > { %3765 = shalt.err (!%p3762_p1)
}
  0x3c   : > { %3544 = dma.hbm_to_vmem [thread:$0]  (!%p3961_p11), %s5318_s3, 9216, %s3965_s6, [#allocation10], %s3870_s15, %s3870_s15, %s3871_s16  }
  0x3d   : > { %s4020_s14 = sadd.s32 1, %s3866_s21   ;;  %s29_s29 = sadd.s32 1, %s3862_s20 }
  0x3e   : > { %s26_s17 = ssub.s32 %s3866_s21, %s4020_s14  ;;  %p36_p13 = scmp.ne.s32.totalorder %s3862_s20, %s3858_s19 }
  0x3f   : > { %p27_p6 = scmp.eq.s32.totalorder %s26_s17, 0  ;;  %p37_p10 = scmp.eq.s32.totalorder %s3866_s21, 0 }
  0x40   : > { %p5331_p3 = scmp.eq.s32.totalorder %s3931_s22, 1  ;;  %p3555_p7 = scmp.lt.s32.totalorder %s3866_s21, 2 }
  0x41   : > { %s4036_s27 = scalar_select %p27_p6, %s3862_s20, %s29_s29  }
  0x42   : > { %p4030_p5 = por %p5331_p3, %p36_p13  ;;  %p38_p9 = por %p37_p10, %p36_p13 }
  0x43   : > { %s208_s30 = sand.u32 1, %s3862_s20   ;;  %s3224_s6 = sshll.u32 %s3866_s21, 12 }
  0x44   : > { %s5332_s23 = scalar_select %p4030_p5, 1, 0 }
  0x45   : > { %s2967_s7 = sshll.u32 %s208_s30, 8  ;;  %s4043_s8 = scalar_lea.hbm %s5315_s0, %s3224_s6 }
  0x46   : > { %s212_s9 = scalar_lea.vmem [#allocation6], %s2967_s7  ;;  %p4047_p11 = pnand %p3555_p7, %p38_p9 }
  0x47   : > { %s219_s10 = sshll.u32 %s212_s9, 4  ;;  %s4051_s28 = scalar_lea.sflag [#allocation7], %s208_s30  ;;  %s4045_s10 = int_to_ptr.vmem [resolvable:$true] %s219_s10 }
  0x48   : > { %s3766_s12 = scalar_lea.hbm %s4043_s8, 4096  ;;  %p3768_p0 = pneg %p4047_p11 }
  0x49   : > { %p3767_p12 = scmp.ne.s32.totalorder %s4043_s8, %s3766_s12  ;;  %s3771_s17 = scalar_lea.hbm %s5315_s0, 8192 }
  0x4a   : > { %p3772_p13 = scmp.lt.u32.totalorder %s4043_s8, %s5315_s0  ;;  %p3773_p6 = scmp.lt.u32.totalorder %s3771_s17, %s3766_s12 }
  0x4b   : > { %p3769_p2 = pnand %p3768_p0, %p3767_p12  ;;  %p3775_p3 = scmp.lt.u32.totalorder %s3766_s12, %s4043_s8 }
  0x4c   : > { %p3774_p10 = por %p3773_p6, %p3772_p13 }
  0x4d   : > { %p3770_p1 = pneg %p3769_p2 }
  0x4e   : > { %p3776_p7 = por %p3775_p3, %p3774_p10 }
  0x50   : > { %p3777_p9 = pnand %p3776_p7, %p3770_p1 }
  0x52   : > { %3780 = shalt.err (!%p3777_p9)
}
  0x53   : > { %s3781_s30 = scalar_lea.vmem %s4045_s10, 4096  ;;  %s3872_s15 = smov [#allocation6]  }
  0x54   : > { %p3782_p12 = scmp.ne.s32.totalorder %s4045_s10, %s3781_s30  ;;  %s3786_s16 = sshll.u32 %s3872_s15, 4  ;;  %s3787_s16 = int_to_ptr.vmem [resolvable:$false] %s3786_s16 }
  0x55   : > { %s3788_s9 = scalar_lea.vmem %s3787_s16, 8192  ;;  %p3789_p4 = scmp.lt.s32.totalorder %s4045_s10, %s3787_s16 }
  0x56   : > { %p3784_p2 = pnand %p3782_p12, %p3768_p0  ;;  %p3790_p13 = scmp.lt.s32.totalorder %s3788_s9, %s3781_s30 }
  0x58   : > { %p3785_p5 = pneg %p3784_p2  ;;  %p3791_p6 = por %p3790_p13, %p3789_p4 }
  0x5a   : > { %p3792_p10 = pnand %p3791_p6, %p3785_p5 }
  0x5c   : > { %3795 = shalt.err (!%p3792_p10)
}
  0x5d   : > { %s3873_s12 = smov 32   ;;  %s3874_s13 = smov 2  }
  0x5e   : > { %3548 = dma.hbm_to_vmem [thread:$0]  (!%p4047_p11), %s4043_s8, 4096, %s4045_s10, %s4051_s28, %s3873_s12, %s3873_s12, %s3874_s13  }
  0x5f   : > { %231 = sbr.rel (%p3950_p8) target bundleno = 921 (0x399), region = 40 }
  0x66   : > { %s4082_s29 = sand.u32 1, %s3858_s19   ;;  %p5334_p4 = scmp.ne.s32.totalorder %s5327_s24, 0 }
  0x67   : > { %s2971_s17 = sshll.u32 %s4082_s29, 8  ;;  %s234_s7 = scalar_lea.sflag [#allocation7], %s4082_s29 }
  0x68   : > { %s4086_s6 = scalar_lea.vmem [#allocation6], %s2971_s17 }
  0x69   : > { %3841 = dma.done.wait (%p5334_p4), %s234_s7, 4096  }
  0x6a   : > { %3843 = vsyncadd (%p5334_p4), %s234_s7, 4294963200  ;;  %p5335_p5 = scmp.eq.s32.totalorder %s3931_s22, 0 }
  0x6c   : > { %3845 = dma.done.wait (%p5335_p5), [#allocation10], 13824   ;;  %p5336_p8 = pmov %p5335_p5 }
  0x6d   : > { %vm722_vm0 = vcmask 523264   ;;  %vm724_vm1 = vcmask 517120   ;;  %v3875_v0 = vmov 0.0   ;;  %v4117_v1 = vld [vmem:[%s4086_s6] sm:$0x1]  ;;  %vm809_vm2 = vcmask 1041409  }
  0x6e   : > { %3847 = vsyncadd (%p5336_p8), [#allocation10], 4294953472  ;;  %726 = vst.msk [vmem:[#allocation2 + $0x10] sm:$0xff] %vm722_vm0, %v3875_v0  ;;  %v4120_v2 = vld [vmem:[%s4086_s6 + $0x2] sm:$0x1]  ;;  %vm812_vm3 = vcmask 1042434  }
  0x6f   : > { %727 = vst.msk [vmem:[#allocation2 + $0x18] sm:$0x3] %vm724_vm1, %v3875_v0  ;;  %729 = vst.msk [vmem:[#allocation2 + $0x28] sm:$0x3] %vm724_vm1, %v3875_v0  ;;  %v4123_v3 = vld [vmem:[%s4086_s6 + $0x4] sm:$0x1] }
  0x70   : > { %728 = vst.msk [vmem:[#allocation2 + $0x20] sm:$0xff] %vm722_vm0, %v3875_v0  ;;  %723 = vst.msk [vmem:[#allocation2] sm:$0xff] %vm722_vm0, %v3875_v0  ;;  %v4126_v4 = vld [vmem:[%s4086_s6 + $0x6] sm:$0x1]  ;;  %v4129_v5 = vld [vmem:[%s4086_s6 + $0x1] sm:$0x1] }
  0x71   : > { %725 = vst.msk [vmem:[#allocation2 + $0x8] sm:$0x3] %vm724_vm1, %v3875_v0  ;;  %731 = vst.msk [vmem:[#allocation2 + $0x38] sm:$0x3] %vm724_vm1, %v3875_v0  ;;  %v4132_v6 = vld [vmem:[%s4086_s6 + $0x3] sm:$0x1]  ;;  %v530_v41 = vmax.f32 %v4117_v1, %v4129_v5 }
  0x72   : > { %730 = vst.msk [vmem:[#allocation2 + $0x30] sm:$0xff] %vm722_vm0, %v3875_v0  ;;  %732 = vst.msk [vmem:[#allocation2 + $0x40] sm:$0xff] %vm722_vm0, %v3875_v0  ;;  %v4135_v7 = vld [vmem:[%s4086_s6 + $0x5] sm:$0x1]  ;;  %v4138_v8 = vld [vmem:[%s4086_s6 + $0x7] sm:$0x1]  ;;  %v531_v42 = vmax.f32 %v4120_v2, %v4132_v6 }
  0x73   : > { %733 = vst.msk [vmem:[#allocation2 + $0x48] sm:$0x3] %vm724_vm1, %v3875_v0  ;;  %735 = vst.msk [vmem:[#allocation2 + $0x58] sm:$0x3] %vm724_vm1, %v3875_v0  ;;  %v4141_v9 = vld [vmem:[%s4086_s6 + $0x8] sm:$0x1]  ;;  %v532_v43 = vmax.f32 %v4123_v3, %v4135_v7  ;;  %v533_v44 = vmax.f32 %v4126_v4, %v4138_v8 }
  0x74   : > { %734 = vst.msk [vmem:[#allocation2 + $0x50] sm:$0xff] %vm722_vm0, %v3875_v0  ;;  %736 = vst.msk [vmem:[#allocation2 + $0x60] sm:$0xff] %vm722_vm0, %v3875_v0  ;;  %v4144_v10 = vld [vmem:[%s4086_s6 + $0xa] sm:$0x1]  ;;  %v4147_v11 = vld [vmem:[%s4086_s6 + $0xc] sm:$0x1] }
  0x75   : > { %737 = vst.msk [vmem:[#allocation2 + $0x68] sm:$0x3] %vm724_vm1, %v3875_v0  ;;  %739 = vst.msk [vmem:[#allocation2 + $0x78] sm:$0x3] %vm724_vm1, %v3875_v0  ;;  %v4150_v12 = vld [vmem:[%s4086_s6 + $0xe] sm:$0x1] }
  0x76   : > { %738 = vst.msk [vmem:[#allocation2 + $0x70] sm:$0xff] %vm722_vm0, %v3875_v0  ;;  %740 = vst.msk [vmem:[#allocation2 + $0x80] sm:$0xff] %vm722_vm0, %v3875_v0  ;;  %v4153_v13 = vld [vmem:[%s4086_s6 + $0x9] sm:$0x1]  ;;  %v4156_v14 = vld [vmem:[%s4086_s6 + $0xb] sm:$0x1] }
  0x77   : > { %741 = vst.msk [vmem:[#allocation2 + $0x88] sm:$0x3] %vm724_vm1, %v3875_v0  ;;  %743 = vst.msk [vmem:[#allocation2 + $0x98] sm:$0x3] %vm724_vm1, %v3875_v0  ;;  %v4159_v15 = vld [vmem:[%s4086_s6 + $0xd] sm:$0x1]  ;;  %v534_v49 = vmax.f32 %v4141_v9, %v4153_v13  ;;  %v535_v50 = vmax.f32 %v4144_v10, %v4156_v14 }
  0x78   : > { %742 = vst.msk [vmem:[#allocation2 + $0x90] sm:$0xff] %vm722_vm0, %v3875_v0  ;;  %1703 = vst [vmem:[#allocation4] sm:$0xff] %v3875_v0  ;;  %v4162_v16 = vld [vmem:[%s4086_s6 + $0xf] sm:$0x1]  ;;  %v4165_v17 = vld [vmem:[%s4086_s6 + $0x20] sm:$0x1]  ;;  %v536_v51 = vmax.f32 %v4147_v11, %v4159_v15 }
  0x79   : > { %1704 = vst [vmem:[#allocation4 + $0x8] sm:$0x3] %v3875_v0  ;;  %1705 = vst [vmem:[#allocation4 + $0x10] sm:$0xff] %v3875_v0  ;;  %v4168_v18 = vld [vmem:[%s4086_s6 + $0x22] sm:$0x1]  ;;  %v537_v52 = vmax.f32 %v4150_v12, %v4162_v16  ;;  %vm815_vm4 = vcmask 1043459  }
  0x7a   : > { %1706 = vst [vmem:[#allocation4 + $0x18] sm:$0x3] %v3875_v0  ;;  %1707 = vst [vmem:[#allocation4 + $0x20] sm:$0xff] %v3875_v0  ;;  %v4171_v19 = vld [vmem:[%s4086_s6 + $0x24] sm:$0x1]  ;;  %vm818_vm5 = vcmask 1044484  }
  0x7b   : > { %1708 = vst [vmem:[#allocation4 + $0x28] sm:$0x3] %v3875_v0  ;;  %1709 = vst [vmem:[#allocation4 + $0x30] sm:$0xff] %v3875_v0  ;;  %v4174_v20 = vld [vmem:[%s4086_s6 + $0x26] sm:$0x1]  ;;  %vm821_vm6 = vcmask 1045509  }
  0x7c   : > { %1710 = vst [vmem:[#allocation4 + $0x38] sm:$0x3] %v3875_v0  ;;  %1711 = vst [vmem:[#allocation4 + $0x40] sm:$0xff] %v3875_v0  ;;  %v4177_v21 = vld [vmem:[%s4086_s6 + $0x21] sm:$0x1]  ;;  %vm824_vm7 = vcmask 1046534  }
  0x7d   : > { %1712 = vst [vmem:[#allocation4 + $0x48] sm:$0x3] %v3875_v0  ;;  %1713 = vst [vmem:[#allocation4 + $0x50] sm:$0xff] %v3875_v0  ;;  %v4180_v22 = vld [vmem:[%s4086_s6 + $0x23] sm:$0x1]  ;;  %v538_v58 = vmax.f32 %v4165_v17, %v4177_v21  ;;  %vm827_vm8 = vcmask 1047559  }
  0x7e   : > { %1714 = vst [vmem:[#allocation4 + $0x58] sm:$0x3] %v3875_v0  ;;  %1715 = vst [vmem:[#allocation4 + $0x60] sm:$0xff] %v3875_v0  ;;  %v4183_v23 = vld [vmem:[%s4086_s6 + $0x25] sm:$0x1]  ;;  %v539_v59 = vmax.f32 %v4168_v18, %v4180_v22  ;;  %s3876_s24 = smov 64  }
  0x7f   : > { %1716 = vst [vmem:[#allocation4 + $0x68] sm:$0x3] %v3875_v0  ;;  %1717 = vst [vmem:[#allocation4 + $0x70] sm:$0xff] %v3875_v0  ;;  %v4186_v24 = vld [vmem:[%s4086_s6 + $0x27] sm:$0x1]  ;;  %v540_v60 = vmax.f32 %v4171_v19, %v4183_v23  ;;  %vm988_vm9 = vcmask 1048064  }
  0x80   : > { %1718 = vst [vmem:[#allocation4 + $0x78] sm:$0x3] %v3875_v0  ;;  %1719 = vst [vmem:[#allocation4 + $0x80] sm:$0xff] %v3875_v0  ;;  %v4189_v25 = vld [vmem:[%s4086_s6 + $0x28] sm:$0x1]  ;;  %v541_v61 = vmax.f32 %v4174_v20, %v4186_v24  ;;  %s2974_s9 = sshll.u32 %s4082_s29, 6 }
  0x81   : > { %1720 = vst [vmem:[#allocation4 + $0x88] sm:$0x3] %v3875_v0  ;;  %1721 = vst [vmem:[#allocation4 + $0x90] sm:$0xff] %v3875_v0  ;;  %v4192_v26 = vld [vmem:[%s4086_s6 + $0x2a] sm:$0x1]  ;;  %s5254_s12 = scalar_lea.vmem [#allocation12], %s2974_s9 }
  0x82   : > { %1722 = vst [vmem:[#allocation4 + $0x98] sm:$0x3] %v3875_v0  ;;  %v4195_v27 = vld [vmem:[%s4086_s6 + $0x29] sm:$0x1]  ;;  %v4198_v28 = vld [vmem:[%s4086_s6 + $0x2b] sm:$0x1] }
  0x83   : > { %v4201_v29 = vld [vmem:[%s4086_s6 + $0x12] sm:$0x1]  ;;  %v4204_v30 = vld [vmem:[%s4086_s6 + $0x2c] sm:$0x1]  ;;  %v4207_v31 = vld [vmem:[%s4086_s6 + $0x2e] sm:$0x1]  ;;  %v542_v4 = vmax.f32 %v4189_v25, %v4195_v27  ;;  %v543_v6 = vmax.f32 %v4192_v26, %v4198_v28 }
  0x84   : > { %v4210_v32 = vld [vmem:[%s4086_s6 + $0x2d] sm:$0x1]  ;;  %v4213_v33 = vld [vmem:[%s4086_s6 + $0x2f] sm:$0x1]  ;;  %v4216_v34 = vld [vmem:[%s4086_s6 + $0x14] sm:$0x1] }
  0x85   : > { %v4219_v35 = vld [vmem:[%s4086_s6 + $0x16] sm:$0x1]  ;;  %v4222_v36 = vld [vmem:[%s4086_s6 + $0x18] sm:$0x1]  ;;  %v4225_v37 = vld [vmem:[%s4086_s6 + $0x10] sm:$0x1]  ;;  %v544_v12 = vmax.f32 %v4204_v30, %v4210_v32  ;;  %v545_v13 = vmax.f32 %v4207_v31, %v4213_v33 }
  0x86   : > { %v4228_v38 = vld [vmem:[%s4086_s6 + $0x1a] sm:$0x1]  ;;  %v4231_v39 = vld [vmem:[%s4086_s6 + $0x1c] sm:$0x1]  ;;  %v4234_v40 = vld [vmem:[%s4086_s6 + $0x1e] sm:$0x1] }
  0x87   : > { %v4245_v45 = vld [vmem:[%s4086_s6 + $0x30] sm:$0x1]  ;;  %v4248_v46 = vld [vmem:[%s4086_s6 + $0x32] sm:$0x1]  ;;  %v4251_v47 = vld [vmem:[%s4086_s6 + $0x34] sm:$0x1] }
  0x88   : > { %v4254_v48 = vld [vmem:[%s4086_s6 + $0x36] sm:$0x1]  ;;  %v2987_v53 = vld [vmem:[%s4086_s6 + $0x38] sm:$0x1]  ;;  %v4266_v54 = vld [vmem:[%s4086_s6 + $0x3a] sm:$0x1] }
  0x89   : > { %v3039_v55 = vld [vmem:[%s4086_s6 + $0x11] sm:$0x1]  ;;  %v3040_v56 = vld [vmem:[%s4086_s6 + $0x13] sm:$0x1]  ;;  %v3041_v57 = vld [vmem:[%s4086_s6 + $0x15] sm:$0x1] }
  0x8a   : > { %v2989_v62 = vld [vmem:[%s4086_s6 + $0x3c] sm:$0x1]  ;;  %v2990_v63 = vld [vmem:[%s4086_s6 + $0x3e] sm:$0x1]  ;;  %v3042_v0 = vld [vmem:[%s4086_s6 + $0x17] sm:$0x1]  ;;  %v595_v7 = vmax.f32 %v4201_v29, %v3040_v56  ;;  %v596_v8 = vmax.f32 %v4216_v34, %v3041_v57  ;;  %v594_v19 = vmax.f32 %v4225_v37, %v3039_v55 }
  0x8b   : > { %v3043_v2 = vld [vmem:[%s4086_s6 + $0x19] sm:$0x1]  ;;  %v3044_v3 = vld [vmem:[%s4086_s6 + $0x1b] sm:$0x1]  ;;  %v3045_v9 = vld [vmem:[%s4086_s6 + $0x1d] sm:$0x1]  ;;  %v597_v14 = vmax.f32 %v4219_v35, %v3042_v0 }
  0x8c   : > { %v3046_v10 = vld [vmem:[%s4086_s6 + $0x1f] sm:$0x1]  ;;  %v3047_v11 = vld [vmem:[%s4086_s6 + $0x31] sm:$0x1]  ;;  %v598_v15 = vmax.f32 %v4222_v36, %v3043_v2  ;;  %v3048_v16 = vld [vmem:[%s4086_s6 + $0x33] sm:$0x1]  ;;  %v599_v20 = vmax.f32 %v4228_v38, %v3044_v3  ;;  %v600_v21 = vmax.f32 %v4231_v39, %v3045_v9  ;;  %v659_v33 = vmax.f32 %v531_v42, %v595_v7 }
  0x8d   : > { %v3049_v17 = vld [vmem:[%s4086_s6 + $0x35] sm:$0x1]  ;;  %v3050_v18 = vld [vmem:[%s4086_s6 + $0x37] sm:$0x1]  ;;  %v601_v22 = vmax.f32 %v4234_v40, %v3046_v10  ;;  %v3051_v23 = vld [vmem:[%s4086_s6 + $0x39] sm:$0x1]  ;;  %v602_v26 = vmax.f32 %v4245_v45, %v3047_v11  ;;  %v603_v27 = vmax.f32 %v4248_v46, %v3048_v16  ;;  %v660_v34 = vmax.f32 %v532_v43, %v596_v8 }
  0x8e   : > { %v3052_v24 = vld [vmem:[%s4086_s6 + $0x3b] sm:$0x1]  ;;  %v3053_v25 = vld [vmem:[%s4086_s6 + $0x3d] sm:$0x1]  ;;  %v604_v28 = vmax.f32 %v4251_v47, %v3049_v17  ;;  %v605_v29 = vmax.f32 %v4254_v48, %v3050_v18  ;;  %v3054_v30 = vld [vmem:[%s4086_s6 + $0x3f] sm:$0x1]  ;;  %v606_v31 = vmax.f32 %v2987_v53, %v3051_v23  ;;  %v661_v37 = vmax.f32 %v533_v44, %v597_v14 }
  0x8f   : > { %v607_v32 = vmax.f32 %v4266_v54, %v3052_v24  ;;  %v608_v35 = vmax.f32 %v2989_v62, %v3053_v25  ;;  %v609_v36 = vmax.f32 %v2990_v63, %v3054_v30  ;;  %v662_v38 = vmax.f32 %v534_v49, %v598_v15  ;;  %v4334_v14 = vld [vmem:[%s4086_s6 + $0x42] sm:$0x1]  ;;  %v4337_v15 = vld [vmem:[%s4086_s6 + $0x44] sm:$0x1]  ;;  %v4340_v16 = vld [vmem:[%s4086_s6 + $0x46] sm:$0x1] }
  0x90   : > { %v658_v39 = vmax.f32 %v530_v41, %v594_v19  ;;  %v663_v40 = vmax.f32 %v535_v50, %v599_v20  ;;  %v664_v45 = vmax.f32 %v536_v51, %v600_v21  ;;  %v667_v46 = vmax.f32 %v539_v59, %v603_v27  ;;  %v4343_v17 = vld [vmem:[%s4086_s6 + $0x41] sm:$0x1]  ;;  %v4346_v18 = vld [vmem:[%s4086_s6 + $0x43] sm:$0x1]  ;;  %v4349_v19 = vld [vmem:[%s4086_s6 + $0x45] sm:$0x1] }
  0x91   : > { %v665_v47 = vmax.f32 %v537_v52, %v601_v22  ;;  %v668_v48 = vmax.f32 %v540_v60, %v604_v28  ;;  %v669_v55 = vmax.f32 %v541_v61, %v605_v29  ;;  %v670_v53 = vmax.f32 %v542_v4, %v606_v31  ;;  %v4352_v20 = vld [vmem:[%s4086_s6 + $0x47] sm:$0x1]  ;;  %v4357_v22 = vld [vmem:[%s4086_s6 + $0x48] sm:$0x1]  ;;  %v4360_v23 = vld [vmem:[%s4086_s6 + $0x4a] sm:$0x1] }
  0x92   : > { %v666_v56 = vmax.f32 %v538_v58, %v602_v26  ;;  %v671_v54 = vmax.f32 %v543_v6, %v607_v32  ;;  %v808_v42 = vrot.slane %v659_v33, 7  ;;  %v811_v43 = vrot.slane %v660_v34, 6  ;;  %v4363_v24 = vld [vmem:[%s4086_s6 + $0x4c] sm:$0x1]  ;;  %v4366_v25 = vld [vmem:[%s4086_s6 + $0x4e] sm:$0x1] }
  0x93   : > { %v672_v57 = vmax.f32 %v544_v12, %v608_v35  ;;  %v673_v62 = vmax.f32 %v545_v13, %v609_v36  ;;  %v814_v63 = vrot.slane %v661_v37, 5  ;;  %v817_v44 = vrot.slane %v662_v38, 4  ;;  %v4331_v13 = vld [vmem:[%s4086_s6 + $0x40] sm:$0x1]  ;;  %v4369_v26 = vld [vmem:[%s4086_s6 + $0x49] sm:$0x1] }
  0x94   : > { %v810_v49 = vsel %vm809_vm2, %v808_v42, %v658_v39  ;;  %v820_v0 = vrot.slane %v663_v40, 3  ;;  %v829_v1 = vrot.slane %v667_v46, 7  ;;  %v831_v5 = vrot.slane %v668_v48, 6  ;;  %v4372_v27 = vld [vmem:[%s4086_s6 + $0x4b] sm:$0x1]  ;;  %s3225_s13 = sshll.u32 %s3931_s22, 10 }
  0x95   : > { %v813_v41 = vsel %vm812_vm3, %v811_v43, %v810_v49  ;;  %v823_v50 = vrot.slane %v664_v45, 2  ;;  %v833_v51 = vrot.slane %v669_v55, 5  ;;  %v835_v52 = vrot.slane %v670_v53, 4  ;;  %v4375_v28 = vld [vmem:[%s4086_s6 + $0x4d] sm:$0x1]  ;;  %s2870_s17 = sshll.u32 %s5254_s12, 4  ;;  %s5268_s17 = int_to_ptr.vmem [resolvable:$true] %s2870_s17 }
  0x96   : > { %v816_v58 = vsel %vm815_vm4, %v814_v63, %v813_v41  ;;  %v826_v59 = vrot.slane %v665_v47, 1  ;;  %v830_v60 = vsel %vm809_vm2, %v829_v1, %v666_v56  ;;  %v837_v61 = vrot.slane %v671_v54, 3  ;;  %v4378_v29 = vld [vmem:[%s4086_s6 + $0x4f] sm:$0x1]  ;;  %v4382_v31 = vld [vmem:[%s4086_s6 + $0x60] sm:$0x1] }
  0x97   : > { %v819_v2 = vsel %vm818_vm5, %v817_v44, %v816_v58  ;;  %v832_v3 = vsel %vm812_vm3, %v831_v5, %v830_v60  ;;  %v839_v4 = vrot.slane %v672_v57, 2  ;;  %v841_v8 = vrot.slane %v673_v62, 1  ;;  %v4385_v32 = vld [vmem:[%s4086_s6 + $0x62] sm:$0x1]  ;;  %v4388_v33 = vld [vmem:[%s4086_s6 + $0x64] sm:$0x1] }
  0x98   : > { %v822_v6 = vsel %vm821_vm6, %v820_v0, %v819_v2  ;;  %v834_v7 = vsel %vm815_vm4, %v833_v51, %v832_v3  ;;  %v4391_v34 = vld [vmem:[%s4086_s6 + $0x66] sm:$0x1]  ;;  %v4394_v35 = vld [vmem:[%s4086_s6 + $0x61] sm:$0x1]  ;;  %v4397_v36 = vld [vmem:[%s4086_s6 + $0x63] sm:$0x1]  ;;  %v546_v44 = vmax.f32 %v4331_v13, %v4343_v17  ;;  %v547_v49 = vmax.f32 %v4334_v14, %v4346_v18 }
  0x99   : > { %v825_v9 = vsel %vm824_vm7, %v823_v50, %v822_v6  ;;  %v836_v10 = vsel %vm818_vm5, %v835_v52, %v834_v7  ;;  %v4400_v37 = vld [vmem:[%s4086_s6 + $0x65] sm:$0x1]  ;;  %v4404_v38 = vld [vmem:[%s4086_s6 + $0x68] sm:$0x1]  ;;  %v4407_v39 = vld [vmem:[%s4086_s6 + $0x6a] sm:$0x1]  ;;  %v548_v0 = vmax.f32 %v4337_v15, %v4349_v19  ;;  %v549_v1 = vmax.f32 %v4340_v16, %v4352_v20 }
  0x9a   : > { %v828_v11 = vsel %vm827_vm8, %v826_v59, %v825_v9  ;;  %v838_v12 = vsel %vm821_vm6, %v837_v61, %v836_v10  ;;  %v4410_v40 = vld [vmem:[%s4086_s6 + $0x67] sm:$0x1]  ;;  %v4413_v45 = vld [vmem:[%s4086_s6 + $0x69] sm:$0x1]  ;;  %v4416_v46 = vld [vmem:[%s4086_s6 + $0x6b] sm:$0x1]  ;;  %v550_v51 = vmax.f32 %v4357_v22, %v4369_v26  ;;  %v551_v52 = vmax.f32 %v4360_v23, %v4372_v27 }
  0x9b   : > { %v840_v21 = vsel %vm824_vm7, %v839_v4, %v838_v12  ;;  %936 = vst.msk [vmem:[#allocation2 + $0x11] sm:$0xff] %vm722_vm0, %v828_v11  ;;  %v4419_v47 = vld [vmem:[%s4086_s6 + $0x6c] sm:$0x1]  ;;  %v4422_v48 = vld [vmem:[%s4086_s6 + $0x6e] sm:$0x1]  ;;  %v552_v58 = vmax.f32 %v4363_v24, %v4375_v28  ;;  %v553_v59 = vmax.f32 %v4366_v25, %v4378_v29  ;;  %v554_v7 = vmax.f32 %v4382_v31, %v4394_v35  ;;  %v960_v17 = vld [vmem:[#allocation2 + $0x1] sm:$0xff] }
  0x9c   : > { %v842_v30 = vsel %vm827_vm8, %v841_v8, %v840_v21  ;;  %v4425_v55 = vld [vmem:[%s4086_s6 + $0x6d] sm:$0x1]  ;;  %v4428_v53 = vld [vmem:[%s4086_s6 + $0x6f] sm:$0x1]  ;;  %v4431_v56 = vld [vmem:[%s4086_s6 + $0x50] sm:$0x1]  ;;  %v555_v8 = vmax.f32 %v4385_v32, %v4397_v36  ;;  %v556_v9 = vmax.f32 %v4388_v33, %v4400_v37  ;;  %v557_v10 = vmax.f32 %v4391_v34, %v4410_v40 }
  0x9d   : > { %937 = vst.msk [vmem:[#allocation2 + $0x21] sm:$0xff] %vm722_vm0, %v842_v30  ;;  %v2992_v54 = vld [vmem:[%s4086_s6 + $0x52] sm:$0x1]  ;;  %v4435_v42 = vld [vmem:[%s4086_s6 + $0x54] sm:$0x1]  ;;  %v558_v19 = vmax.f32 %v4404_v38, %v4413_v45  ;;  %v559_v20 = vmax.f32 %v4407_v39, %v4416_v46  ;;  %v560_v26 = vmax.f32 %v4419_v47, %v4425_v55  ;;  %v561_v27 = vmax.f32 %v4422_v48, %v4428_v53  ;;  %s2857_s22 = scalar_lea.sflag [#allocation8], %s4082_s29 }
  0x9e   : > { %v4438_v43 = vld [vmem:[%s4086_s6 + $0x56] sm:$0x1]  ;;  %v4441_v57 = vld [vmem:[%s4086_s6 + $0x58] sm:$0x1]  ;;  %v4444_v62 = vld [vmem:[%s4086_s6 + $0x5a] sm:$0x1] }
  0x9f   : > { %v4447_v63 = vld [vmem:[%s4086_s6 + $0x5c] sm:$0x1]  ;;  %v4458_v5 = vld [vmem:[%s4086_s6 + $0x5e] sm:$0x1]  ;;  %v4461_v41 = vld [vmem:[%s4086_s6 + $0x70] sm:$0x1] }
  0xa0   : > { %v4464_v50 = vld [vmem:[%s4086_s6 + $0x72] sm:$0x1]  ;;  %v3001_v60 = vld [vmem:[%s4086_s6 + $0x74] sm:$0x1]  ;;  %v3002_v61 = vld [vmem:[%s4086_s6 + $0x76] sm:$0x1] }
  0xa1   : > { %v3003_v2 = vld [vmem:[%s4086_s6 + $0x78] sm:$0x1]  ;;  %v3055_v3 = vld [vmem:[%s4086_s6 + $0x51] sm:$0x1]  ;;  %v3056_v4 = vld [vmem:[%s4086_s6 + $0x53] sm:$0x1] }
  0xa2   : > { %v3057_v6 = vld [vmem:[%s4086_s6 + $0x55] sm:$0x1]  ;;  %v3004_v12 = vld [vmem:[%s4086_s6 + $0x7a] sm:$0x1]  ;;  %v3005_v14 = vld [vmem:[%s4086_s6 + $0x7c] sm:$0x1]  ;;  %v611_v21 = vmax.f32 %v2992_v54, %v3056_v4  ;;  %v610_v28 = vmax.f32 %v4431_v56, %v3055_v3 }
  0xa3   : > { %v1009_v11 = vld [vmem:[#allocation2 + $0x10] sm:$0xff]  ;;  %v3006_v15 = vld [vmem:[%s4086_s6 + $0x7e] sm:$0x1]  ;;  %v3059_v18 = vld [vmem:[%s4086_s6 + $0x59] sm:$0x1]  ;;  %v612_v22 = vmax.f32 %v4435_v42, %v3057_v6  ;;  %s3796_s26 = scalar_lea.vmem %s5268_s17, 1024 }
  0xa4   : > { %v3058_v16 = vld [vmem:[%s4086_s6 + $0x57] sm:$0x1]  ;;  %v3060_v23 = vld [vmem:[%s4086_s6 + $0x5b] sm:$0x1]  ;;  %v3061_v24 = vld [vmem:[%s4086_s6 + $0x5d] sm:$0x1]  ;;  %v614_v33 = vmax.f32 %v4441_v57, %v3059_v18  ;;  %v675_v47 = vmax.f32 %v547_v49, %v611_v21  ;;  %p3797_p11 = scmp.ne.s32.totalorder %s5268_s17, %s3796_s26 }
  0xa5   : > { %v3062_v25 = vld [vmem:[%s4086_s6 + $0x5f] sm:$0x1]  ;;  %v613_v29 = vmax.f32 %v4438_v43, %v3058_v16  ;;  %v1010_v30 = vld [vmem:[#allocation2 + $0x20] sm:$0xff]  ;;  %v3063_v31 = vld [vmem:[%s4086_s6 + $0x71] sm:$0x1]  ;;  %v615_v34 = vmax.f32 %v4444_v62, %v3060_v23  ;;  %v616_v35 = vmax.f32 %v4447_v63, %v3061_v24  ;;  %v676_v43 = vmax.f32 %v548_v0, %v612_v22  ;;  %p5348_p0 = scmp.ne.s32.totalorder %s5332_s23, 0 }
  0xa6   : > { %v3064_v32 = vld [vmem:[%s4086_s6 + $0x73] sm:$0x1]  ;;  %v617_v36 = vmax.f32 %v4458_v5, %v3062_v25  ;;  %v1017_v37 = vpack.c.bf16 %v1010_v30, %v1009_v11  ;;  %v3065_v38 = vld [vmem:[%s4086_s6 + $0x75] sm:$0x1]  ;;  %v3066_v39 = vld [vmem:[%s4086_s6 + $0x77] sm:$0x1]  ;;  %v618_v45 = vmax.f32 %v4461_v41, %v3063_v31  ;;  %v674_v41 = vmax.f32 %v546_v44, %v610_v28 }
  0xa7   : > { %v3067_v40 = vld [vmem:[%s4086_s6 + $0x79] sm:$0x1]  ;;  %v619_v46 = vmax.f32 %v4464_v50, %v3064_v32  ;;  %v3068_v48 = vld [vmem:[%s4086_s6 + $0x7b] sm:$0x1]  ;;  %v3069_v55 = vld [vmem:[%s4086_s6 + $0x7d] sm:$0x1]  ;;  %v620_v56 = vmax.f32 %v3001_v60, %v3065_v38  ;;  %v621_v54 = vmax.f32 %v3002_v61, %v3066_v39  ;;  %v677_v5 = vmax.f32 %v549_v1, %v613_v29  ;;  %p3798_p1 = pnand %p3797_p11, %p5348_p0 }
  0xa8   : > { %v3070_v53 = vld [vmem:[%s4086_s6 + $0x7f] sm:$0x1]  ;;  %v622_v42 = vmax.f32 %v3003_v2, %v3067_v40  ;;  %1025 = vrot.lane.b32.xlu0 %v1017_v37, %s3876_s24  ;;  %v623_v57 = vmax.f32 %v3004_v12, %v3068_v48  ;;  %v624_v62 = vmax.f32 %v3005_v14, %v3069_v55  ;;  %v678_v50 = vmax.f32 %v550_v51, %v614_v33  ;;  %v961_v44 = vld [vmem:[#allocation2 + $0x11] sm:$0xff]  ;;  %v4549_v37 = vld [vmem:[%s4086_s6 + $0x83] sm:$0x1]  ;;  %s3877_s8 = smov [#allocation12]  }
  0xa9   : > { %v625_v63 = vmax.f32 %v3006_v15, %v3070_v53  ;;  %v679_v49 = vmax.f32 %v551_v52, %v615_v34  ;;  %v680_v3 = vmax.f32 %v552_v58, %v616_v35  ;;  %v681_v4 = vmax.f32 %v553_v59, %v617_v36  ;;  %v4540_v34 = vld [vmem:[%s4086_s6 + $0x80] sm:$0x1]  ;;  %v4543_v35 = vld [vmem:[%s4086_s6 + $0x82] sm:$0x1]  ;;  %v4546_v36 = vld [vmem:[%s4086_s6 + $0x81] sm:$0x1]  ;;  %p3799_p3 = pneg %p3798_p1 }
  0xaa   : > { %v683_v6 = vmax.f32 %v555_v8, %v619_v46  ;;  %v684_v60 = vmax.f32 %v556_v9, %v620_v56  ;;  %v685_v61 = vmax.f32 %v557_v10, %v621_v54  ;;  %v682_v2 = vmax.f32 %v554_v7, %v618_v45  ;;  %v4554_v39 = vld [vmem:[%s4086_s6 + $0x84] sm:$0x1]  ;;  %v4557_v40 = vld [vmem:[%s4086_s6 + $0x86] sm:$0x1]  ;;  %v4560_v45 = vld [vmem:[%s4086_s6 + $0x88] sm:$0x1] }
  0xab   : > { %v686_v0 = vmax.f32 %v558_v19, %v622_v42  ;;  %v687_v11 = vmax.f32 %v559_v20, %v623_v57  ;;  %v688_v16 = vmax.f32 %v560_v26, %v624_v62  ;;  %v689_v18 = vmax.f32 %v561_v27, %v625_v63  ;;  %v4563_v46 = vld [vmem:[%s4086_s6 + $0x8a] sm:$0x1]  ;;  %v4569_v48 = vld [vmem:[%s4086_s6 + $0x87] sm:$0x1]  ;;  %v4572_v55 = vld [vmem:[%s4086_s6 + $0x89] sm:$0x1] }
  0xac   : > { %v843_v12 = vrot.slane %v675_v47, 7  ;;  %v845_v14 = vrot.slane %v676_v43, 6  ;;  %v847_v15 = vrot.slane %v677_v5, 5  ;;  %v849_v1 = vrot.slane %v678_v50, 4  ;;  %v4566_v47 = vld [vmem:[%s4086_s6 + $0x85] sm:$0x1] }
  0xad   : > { %v851_v21 = vrot.slane %v679_v49, 3  ;;  %v853_v22 = vrot.slane %v680_v3, 2  ;;  %v857_v13 = vrot.slane %v683_v6, 7  ;;  %v859_v52 = vrot.slane %v684_v60, 6  ;;  %v4575_v53 = vld [vmem:[%s4086_s6 + $0x8b] sm:$0x1] }
  0xae   : > { %v844_v51 = vsel %vm809_vm2, %v843_v12, %v674_v41  ;;  %v861_v58 = vrot.slane %v685_v61, 5  ;;  %v863_v59 = vrot.slane %v686_v0, 4  ;;  %v855_v8 = vrot.slane %v681_v4, 1  ;;  %v4579_v56 = vld [vmem:[%s4086_s6 + $0x8c] sm:$0x1]  ;;  %s3800_s10 = sshll.u32 %s3877_s8, 4  ;;  %s3801_s10 = int_to_ptr.vmem [resolvable:$false] %s3800_s10 }
  0xaf   : > { %v846_v7 = vsel %vm812_vm3, %v845_v14, %v844_v51  ;;  %v858_v9 = vsel %vm809_vm2, %v857_v13, %v682_v2  ;;  %v865_v10 = vrot.slane %v687_v11, 3  ;;  %v867_v23 = vrot.slane %v688_v16, 2  ;;  %v4582_v54 = vld [vmem:[%s4086_s6 + $0x8e] sm:$0x1]  ;;  %v4585_v42 = vld [vmem:[%s4086_s6 + $0xa0] sm:$0x1]  ;;  %p3803_p7 = scmp.lt.s32.totalorder %s5268_s17, %s3801_s10 }
  0xb0   : > { %v848_v19 = vsel %vm815_vm4, %v847_v15, %v846_v7  ;;  %v860_v20 = vsel %vm812_vm3, %v859_v52, %v858_v9  ;;  %v968_v24 = vpack.c.bf16 %v961_v44, %v960_v17  ;;  %v869_v27 = vrot.slane %v689_v18, 1  ;;  %v4588_v43 = vld [vmem:[%s4086_s6 + $0xa2] sm:$0x1]  ;;  %v4591_v57 = vld [vmem:[%s4086_s6 + $0x8d] sm:$0x1]  ;;  %s3802_s11 = scalar_lea.vmem %s3801_s10, 2048 }
  0xb1   : > { %v850_v25 = vsel %vm818_vm5, %v849_v1, %v848_v19  ;;  %v862_v26 = vsel %vm815_vm4, %v861_v58, %v860_v20  ;;  %v4594_v62 = vld [vmem:[%s4086_s6 + $0x8f] sm:$0x1]  ;;  %v4597_v63 = vld [vmem:[%s4086_s6 + $0xa1] sm:$0x1]  ;;  %v4600_v5 = vld [vmem:[%s4086_s6 + $0xa3] sm:$0x1]  ;;  %v564_v52 = vmax.f32 %v4554_v39, %v4566_v47  ;;  %v565_v58 = vmax.f32 %v4557_v40, %v4569_v48  ;;  %p3804_p9 = scmp.lt.s32.totalorder %s3802_s11, %s3796_s26 }
  0xb2   : > { %v852_v28 = vsel %vm821_vm6, %v851_v21, %v850_v25  ;;  %v864_v29 = vsel %vm818_vm5, %v863_v59, %v862_v26  ;;  %976 = vrot.lane.b32.xlu0 %v968_v24, %s3876_s24  ;;  %v4603_v41 = vld [vmem:[%s4086_s6 + $0xa4] sm:$0x1]  ;;  %v4606_v50 = vld [vmem:[%s4086_s6 + $0xa6] sm:$0x1]  ;;  %v4609_v49 = vld [vmem:[%s4086_s6 + $0xa8] sm:$0x1]  ;;  %v562_v21 = vmax.f32 %v4540_v34, %v4546_v36  ;;  %v566_v59 = vmax.f32 %v4560_v45, %v4572_v55 }
  0xb3   : > { %v854_v30 = vsel %vm824_vm7, %v853_v22, %v852_v28  ;;  %v866_v31 = vsel %vm821_vm6, %v865_v10, %v864_v29  ;;  %v4612_v3 = vld [vmem:[%s4086_s6 + $0xa5] sm:$0x1]  ;;  %v4615_v4 = vld [vmem:[%s4086_s6 + $0xa7] sm:$0x1]  ;;  %v4618_v6 = vld [vmem:[%s4086_s6 + $0xa9] sm:$0x1]  ;;  %v563_v22 = vmax.f32 %v4543_v35, %v4549_v37  ;;  %v567_v7 = vmax.f32 %v4563_v46, %v4575_v53  ;;  %p3805_p12 = por %p3804_p9, %p3803_p7 }
  0xb4   : > { %v856_v32 = vsel %vm827_vm8, %v855_v8, %v854_v30  ;;  %v868_v33 = vsel %vm824_vm7, %v867_v23, %v866_v31  ;;  %v4621_v60 = vld [vmem:[%s4086_s6 + $0xaa] sm:$0x1]  ;;  %v4624_v61 = vld [vmem:[%s4086_s6 + $0xac] sm:$0x1]  ;;  %v4627_v2 = vld [vmem:[%s4086_s6 + $0xae] sm:$0x1]  ;;  %v568_v23 = vmax.f32 %v4579_v56, %v4591_v57  ;;  %v569_v24 = vmax.f32 %v4582_v54, %v4594_v62 }
  0xb5   : > { %v870_v38 = vsel %vm827_vm8, %v869_v27, %v868_v33  ;;  %938 = vst.msk [vmem:[#allocation2 + $0x31] sm:$0xff] %vm722_vm0, %v856_v32  ;;  %v4630_v0 = vld [vmem:[%s4086_s6 + $0xab] sm:$0x1]  ;;  %v4633_v11 = vld [vmem:[%s4086_s6 + $0xad] sm:$0x1]  ;;  %v4657_v13 = vld [vmem:[#allocation2 + $0x21] sm:$0xff]  ;;  %v570_v25 = vmax.f32 %v4585_v42, %v4597_v63  ;;  %v571_v26 = vmax.f32 %v4588_v43, %v4600_v5  ;;  %v572_v33 = vmax.f32 %v4603_v41, %v4612_v3  ;;  %p3806_p2 = pnand %p3805_p12, %p3799_p3 }
  0xb6   : > { %939 = vst.msk [vmem:[#allocation2 + $0x41] sm:$0xff] %vm722_vm0, %v870_v38  ;;  %v4636_v16 = vld [vmem:[%s4086_s6 + $0xaf] sm:$0x1]  ;;  %v4639_v18 = vld [vmem:[%s4086_s6 + $0x92] sm:$0x1]  ;;  %5337 = vst [vmem:[#allocation16_spill] sm:$0xff] %v4657_v13  ;;  %v573_v35 = vmax.f32 %v4606_v50, %v4615_v4  ;;  %v574_v37 = vmax.f32 %v4609_v49, %v4618_v6  ;;  %v575_v48 = vmax.f32 %v4621_v60, %v4630_v0 }
  0xb7   : > { %v4642_v12 = vld [vmem:[%s4086_s6 + $0x90] sm:$0x1]  ;;  %v4645_v14 = vld [vmem:[%s4086_s6 + $0x94] sm:$0x1]  ;;  %v4648_v15 = vld [vmem:[%s4086_s6 + $0x96] sm:$0x1]  ;;  %v576_v55 = vmax.f32 %v4624_v61, %v4633_v11  ;;  %v577_v53 = vmax.f32 %v4627_v2, %v4636_v16 }
  0xb8   : > { %v4651_v1 = vld [vmem:[%s4086_s6 + $0x98] sm:$0x1]  ;;  %v4660_v17 = vld [vmem:[%s4086_s6 + $0x9a] sm:$0x1]  ;;  %v4663_v44 = vld [vmem:[%s4086_s6 + $0x9c] sm:$0x1] }
  0xb9   : > { %v4666_v51 = vld [vmem:[%s4086_s6 + $0x9e] sm:$0x1]  ;;  %v4677_v8 = vld [vmem:[%s4086_s6 + $0xb0] sm:$0x1]  ;;  %v4680_v9 = vld [vmem:[%s4086_s6 + $0xb2] sm:$0x1] }
  0xba   : > { %v4683_v10 = vld [vmem:[%s4086_s6 + $0xb4] sm:$0x1]  ;;  %v3071_v19 = vld [vmem:[%s4086_s6 + $0x91] sm:$0x1]  ;;  %v3072_v20 = vld [vmem:[%s4086_s6 + $0x93] sm:$0x1] }
  0xbb   : > { %v3018_v29 = vld [vmem:[%s4086_s6 + $0xb6] sm:$0x1]  ;;  %v3019_v30 = vld [vmem:[%s4086_s6 + $0xb8] sm:$0x1]  ;;  %v3020_v31 = vld [vmem:[%s4086_s6 + $0xba] sm:$0x1]  ;;  %v627_v38 = vmax.f32 %v4639_v18, %v3072_v20  ;;  %v626_v62 = vmax.f32 %v4642_v12, %v3071_v19 }
  0xbc   : > { %v4695_v27 = vld [vmem:[#allocation2 + $0x30] sm:$0xff]  ;;  %v3021_v40 = vld [vmem:[%s4086_s6 + $0xbc] sm:$0x1]  ;;  %v3022_v45 = vld [vmem:[%s4086_s6 + $0xbe] sm:$0x1] }
  0xbd   : > { %v963_v28 = vld [vmem:[#allocation2 + $0x31] sm:$0xff]  ;;  %v4708_v39 = vld [vmem:[#allocation2 + $0x40] sm:$0xff]  ;;  %v3075_v47 = vld [vmem:[%s4086_s6 + $0x99] sm:$0x1]  ;;  %v691_v12 = vmax.f32 %v563_v22, %v627_v38 }
  0xbe   : > { %v3073_v32 = vld [vmem:[%s4086_s6 + $0x95] sm:$0x1]  ;;  %v3074_v46 = vld [vmem:[%s4086_s6 + $0x97] sm:$0x1]  ;;  %v1018_v54 = vpack.c.bf16 %v4708_v39, %v4695_v27  ;;  %v3076_v42 = vld [vmem:[%s4086_s6 + $0x9b] sm:$0x1]  ;;  %v630_v5 = vmax.f32 %v4651_v1, %v3075_v47  ;;  %v4730_v41 = vpack.c.bf16 %v963_v28, %v4657_v13 }
  0xbf   : > { %v628_v56 = vmax.f32 %v4645_v14, %v3073_v32  ;;  %v3077_v43 = vld [vmem:[%s4086_s6 + $0x9d] sm:$0x1]  ;;  %v3078_v57 = vld [vmem:[%s4086_s6 + $0x9f] sm:$0x1]  ;;  %v629_v63 = vmax.f32 %v4648_v15, %v3074_v46  ;;  %v3079_v50 = vld [vmem:[%s4086_s6 + $0xb1] sm:$0x1]  ;;  %v631_v4 = vmax.f32 %v4660_v17, %v3076_v42  ;;  %v690_v46 = vmax.f32 %v562_v21, %v626_v62 }
  0xc0   : > { %v3080_v49 = vld [vmem:[%s4086_s6 + $0xb3] sm:$0x1]  ;;  %v3081_v3 = vld [vmem:[%s4086_s6 + $0xb5] sm:$0x1]  ;;  %v632_v6 = vmax.f32 %v4663_v44, %v3077_v43  ;;  %v633_v60 = vmax.f32 %v4666_v51, %v3078_v57  ;;  %1027 = vrot.lane.b32.xlu1 %v1018_v54, %s3876_s24  ;;  %v3082_v61 = vld [vmem:[%s4086_s6 + $0xb7] sm:$0x1]  ;;  %v634_v11 = vmax.f32 %v4677_v8, %v3079_v50  ;;  %v694_v32 = vmax.f32 %v566_v59, %v630_v5 }
  0xc1   : > { %v3083_v2 = vld [vmem:[%s4086_s6 + $0xb9] sm:$0x1]  ;;  %v3084_v0 = vld [vmem:[%s4086_s6 + $0xbb] sm:$0x1]  ;;  %v635_v16 = vmax.f32 %v4680_v9, %v3080_v49  ;;  %v636_v18 = vmax.f32 %v4683_v10, %v3081_v3  ;;  %v3085_v14 = vld [vmem:[%s4086_s6 + $0xbd] sm:$0x1]  ;;  %v637_v1 = vmax.f32 %v3018_v29, %v3082_v61  ;;  %v692_v44 = vmax.f32 %v564_v52, %v628_v56 }
  0xc2   : > { %v3086_v15 = vld [vmem:[%s4086_s6 + $0xbf] sm:$0x1]  ;;  %v638_v17 = vmax.f32 %v3019_v30, %v3083_v2  ;;  %v639_v19 = vmax.f32 %v3020_v31, %v3084_v0  ;;  %v640_v20 = vmax.f32 %v3021_v40, %v3085_v14  ;;  %v693_v28 = vmax.f32 %v565_v58, %v629_v63  ;;  %v4779_v61 = vld [vmem:[%s4086_s6 + $0xc4] sm:$0x1]  ;;  %v4782_v2 = vld [vmem:[%s4086_s6 + $0xc1] sm:$0x1] }
  0xc3   : > { %v641_v51 = vmax.f32 %v3022_v45, %v3086_v15  ;;  %v695_v8 = vmax.f32 %v567_v7, %v631_v4  ;;  %v696_v47 = vmax.f32 %v568_v23, %v632_v6  ;;  %v699_v9 = vmax.f32 %v571_v26, %v635_v16  ;;  %v4773_v6 = vld [vmem:[%s4086_s6 + $0xc0] sm:$0x1]  ;;  %v4785_v0 = vld [vmem:[%s4086_s6 + $0xc3] sm:$0x1]  ;;  %v4799_v14 = vld [vmem:[%s4086_s6 + $0xca] sm:$0x1] }
  0xc4   : > { %978 = vrot.lane.b32.xlu1 %v4730_v41, %s3876_s24  ;;  %v697_v22 = vmax.f32 %v569_v24, %v633_v60  ;;  %v700_v10 = vmax.f32 %v572_v33, %v636_v18  ;;  %v701_v29 = vmax.f32 %v573_v35, %v637_v1  ;;  %v702_v30 = vmax.f32 %v574_v37, %v638_v17  ;;  %v4776_v60 = vld [vmem:[%s4086_s6 + $0xc2] sm:$0x1]  ;;  %v4793_v18 = vld [vmem:[%s4086_s6 + $0xc6] sm:$0x1]  ;;  %v4802_v15 = vld [vmem:[%s4086_s6 + $0xcc] sm:$0x1] }
  0xc5   : > { %v698_v31 = vmax.f32 %v570_v25, %v634_v11  ;;  %v703_v52 = vmax.f32 %v575_v48, %v639_v19  ;;  %v871_v38 = vrot.slane %v691_v12, 7  ;;  %v873_v40 = vrot.slane %v692_v44, 6  ;;  %v4788_v11 = vld [vmem:[%s4086_s6 + $0xc5] sm:$0x1]  ;;  %v4796_v12 = vld [vmem:[%s4086_s6 + $0xc8] sm:$0x1] }
  0xc6   : > { %v704_v58 = vmax.f32 %v576_v55, %v640_v20  ;;  %v705_v59 = vmax.f32 %v577_v53, %v641_v51  ;;  %v875_v45 = vrot.slane %v693_v28, 5  ;;  %v877_v56 = vrot.slane %v694_v32, 4  ;;  %v4756_v55 = vld [vmem:[#allocation2 + $0x22] sm:$0xff]  ;;  %v4758_v53 = vld [vmem:[#allocation2 + $0x32] sm:$0xff]  ;;  %v4811_v19 = vld [vmem:[%s4086_s6 + $0xcb] sm:$0x1] }
  0xc7   : > { %v872_v34 = vsel %vm809_vm2, %v871_v38, %v690_v46  ;;  %v879_v36 = vrot.slane %v695_v8, 3  ;;  %v885_v21 = vrot.slane %v699_v9, 7  ;;  %v887_v7 = vrot.slane %v700_v10, 6  ;;  %v4805_v1 = vld [vmem:[%s4086_s6 + $0xc7] sm:$0x1] }
  0xc8   : > { %v874_v23 = vsel %vm812_vm3, %v873_v40, %v872_v34  ;;  %v881_v26 = vrot.slane %v696_v47, 2  ;;  %v889_v24 = vrot.slane %v701_v29, 5  ;;  %v891_v33 = vrot.slane %v702_v30, 4  ;;  %v4808_v17 = vld [vmem:[%s4086_s6 + $0xc9] sm:$0x1]  ;;  %v4860_v40 = vld [vmem:[#allocation2 + $0x41] sm:$0xff] }
  0xc9   : > { %v876_v35 = vsel %vm815_vm4, %v875_v45, %v874_v23  ;;  %v883_v25 = vrot.slane %v697_v22, 1  ;;  %v886_v37 = vsel %vm809_vm2, %v885_v21, %v698_v31  ;;  %v893_v48 = vrot.slane %v703_v52, 3  ;;  %v4814_v44 = vld [vmem:[%s4086_s6 + $0xcd] sm:$0x1]  ;;  %v4818_v51 = vld [vmem:[%s4086_s6 + $0xce] sm:$0x1] }
  0xca   : > { %v878_v54 = vsel %vm818_vm5, %v877_v56, %v876_v35  ;;  %v888_v42 = vsel %vm812_vm3, %v887_v7, %v886_v37  ;;  %v895_v43 = vrot.slane %v704_v58, 2  ;;  %v1002_v57 = vpack.c.bf16 %v4758_v53, %v4756_v55  ;;  %v4821_v28 = vld [vmem:[%s4086_s6 + $0xe0] sm:$0x1]  ;;  %v4824_v32 = vld [vmem:[%s4086_s6 + $0xe2] sm:$0x1]  ;;  %5338 = vst [vmem:[#allocation17_spill] sm:$0xff] %v4860_v40 }
  0xcb   : > { %v880_v62 = vsel %vm821_vm6, %v879_v36, %v878_v54  ;;  %v890_v63 = vsel %vm815_vm4, %v889_v24, %v888_v42  ;;  %v897_v5 = vrot.slane %v705_v59, 1  ;;  %v4827_v46 = vld [vmem:[%s4086_s6 + $0xe4] sm:$0x1]  ;;  %v4830_v8 = vld [vmem:[%s4086_s6 + $0xcf] sm:$0x1]  ;;  %v580_v24 = vmax.f32 %v4779_v61, %v4788_v11 }
  0xcc   : > { %v882_v50 = vsel %vm824_vm7, %v881_v26, %v880_v62  ;;  %v892_v49 = vsel %vm818_vm5, %v891_v33, %v890_v63  ;;  %1006 = vst.msk [vmem:[#allocation3 + $0x30] sm:$0xff] %vm722_vm0, %v1002_v57  ;;  %1150 = vst.msk [vmem:[#allocation3 + $0x20] sm:$0xff] %vm722_vm0, %v1002_v57  ;;  %v4833_v47 = vld [vmem:[%s4086_s6 + $0xe1] sm:$0x1]  ;;  %v4836_v9 = vld [vmem:[%s4086_s6 + $0xe3] sm:$0x1]  ;;  %v579_v26 = vmax.f32 %v4776_v60, %v4785_v0 }
  0xcd   : > { %v884_v3 = vsel %vm827_vm8, %v883_v25, %v882_v50  ;;  %v894_v4 = vsel %vm821_vm6, %v893_v48, %v892_v49  ;;  %v4840_v22 = vld [vmem:[%s4086_s6 + $0xe6] sm:$0x1]  ;;  %v4843_v10 = vld [vmem:[%s4086_s6 + $0xe8] sm:$0x1]  ;;  %v4846_v29 = vld [vmem:[%s4086_s6 + $0xea] sm:$0x1]  ;;  %v581_v37 = vmax.f32 %v4793_v18, %v4805_v1  ;;  %v587_v49 = vmax.f32 %v4824_v32, %v4836_v9 }
  0xce   : > { %v896_v16 = vsel %vm824_vm7, %v895_v43, %v894_v4  ;;  %940 = vst.msk [vmem:[#allocation2 + $0x51] sm:$0xff] %vm722_vm0, %v884_v3  ;;  %v4849_v30 = vld [vmem:[%s4086_s6 + $0xec] sm:$0x1]  ;;  %v4852_v31 = vld [vmem:[%s4086_s6 + $0xe5] sm:$0x1] }
  0xcf   : > { %v898_v20 = vsel %vm827_vm8, %v897_v5, %v896_v16  ;;  %v4855_v52 = vld [vmem:[%s4086_s6 + $0xe7] sm:$0x1]  ;;  %v4858_v38 = vld [vmem:[%s4086_s6 + $0xe9] sm:$0x1]  ;;  %v4863_v58 = vld [vmem:[%s4086_s6 + $0xee] sm:$0x1]  ;;  %v585_v5 = vmax.f32 %v4818_v51, %v4830_v8  ;;  %v588_v3 = vmax.f32 %v4827_v46, %v4852_v31 }
  0xd0   : > { %941 = vst.msk [vmem:[#allocation2 + $0x61] sm:$0xff] %vm722_vm0, %v898_v20  ;;  %v4866_v59 = vld [vmem:[%s4086_s6 + $0xeb] sm:$0x1]  ;;  %v4869_v45 = vld [vmem:[%s4086_s6 + $0xed] sm:$0x1]  ;;  %v589_v18 = vmax.f32 %v4840_v22, %v4855_v52  ;;  %v590_v1 = vmax.f32 %v4843_v10, %v4858_v38 }
  0xd1   : > { %v4872_v56 = vld [vmem:[%s4086_s6 + $0xef] sm:$0x1]  ;;  %v4875_v34 = vld [vmem:[%s4086_s6 + $0xd0] sm:$0x1]  ;;  %v3024_v36 = vld [vmem:[%s4086_s6 + $0xd2] sm:$0x1]  ;;  %v591_v20 = vmax.f32 %v4846_v29, %v4866_v59  ;;  %v592_v51 = vmax.f32 %v4849_v30, %v4869_v45 }
  0xd2   : > { %v4879_v21 = vld [vmem:[%s4086_s6 + $0xd4] sm:$0x1]  ;;  %v4882_v7 = vld [vmem:[%s4086_s6 + $0xd6] sm:$0x1]  ;;  %v4891_v33 = vld [vmem:[%s4086_s6 + $0xd8] sm:$0x1]  ;;  %v593_v10 = vmax.f32 %v4863_v58, %v4872_v56 }
  0xd3   : > { %v4894_v35 = vld [vmem:[%s4086_s6 + $0xda] sm:$0x1]  ;;  %v4897_v25 = vld [vmem:[%s4086_s6 + $0xdc] sm:$0x1]  ;;  %v4908_v43 = vld [vmem:[%s4086_s6 + $0xde] sm:$0x1] }
  0xd4   : > { %v4911_v57 = vld [vmem:[%s4086_s6 + $0xf0] sm:$0x1]  ;;  %v4914_v62 = vld [vmem:[%s4086_s6 + $0xf2] sm:$0x1]  ;;  %v3087_v63 = vld [vmem:[%s4086_s6 + $0xd1] sm:$0x1] }
  0xd5   : > { %v4925_v4 = vld [vmem:[#allocation2 + $0x50] sm:$0xff]  ;;  %v3035_v11 = vld [vmem:[%s4086_s6 + $0xf8] sm:$0x1]  ;;  %v3036_v46 = vld [vmem:[%s4086_s6 + $0xfa] sm:$0x1]  ;;  %v642_v50 = vmax.f32 %v4875_v34, %v3087_v63 }
  0xd6   : > { %5339 = vst [vmem:[#allocation18_spill] sm:$0xff] %v4925_v4  ;;  %v4927_v60 = vld [vmem:[#allocation2 + $0x51] sm:$0xff]  ;;  %v3037_v8 = vld [vmem:[%s4086_s6 + $0xfc] sm:$0x1]  ;;  %v3038_v9 = vld [vmem:[%s4086_s6 + $0xfe] sm:$0x1]  ;;  %v954_v30 = vpack.c.bf16 %v4925_v4, %v4708_v39 }
  0xd7   : > { %v3033_v61 = vld [vmem:[%s4086_s6 + $0xf4] sm:$0x1]  ;;  %v3034_v0 = vld [vmem:[%s4086_s6 + $0xf6] sm:$0x1]  ;;  %v3088_v16 = vld [vmem:[%s4086_s6 + $0xd3] sm:$0x1]  ;;  %v4943_v32 = vpack.c.bf16 %v4927_v60, %v4860_v40 }
  0xd8   : > { %v3089_v31 = vld [vmem:[%s4086_s6 + $0xd5] sm:$0x1]  ;;  %v3090_v22 = vld [vmem:[%s4086_s6 + $0xd7] sm:$0x1]  ;;  %v3091_v52 = vld [vmem:[%s4086_s6 + $0xd9] sm:$0x1]  ;;  %v643_v29 = vmax.f32 %v3024_v36, %v3088_v16 }
  0xd9   : > { %v4955_v38 = vld [vmem:[#allocation2 + $0x60] sm:$0xff]  ;;  %v3092_v59 = vld [vmem:[%s4086_s6 + $0xdb] sm:$0x1]  ;;  %v3093_v45 = vld [vmem:[%s4086_s6 + $0xdd] sm:$0x1]  ;;  %v644_v42 = vmax.f32 %v4879_v21, %v3089_v31  ;;  %v645_v54 = vmax.f32 %v4882_v7, %v3090_v22  ;;  %v646_v23 = vmax.f32 %v4891_v33, %v3091_v52  ;;  %980 = vrot.lane.b32.xlu1 %v4943_v32, %s3876_s24  ;;  %958 = vst.msk [vmem:[#allocation3 + $0x50] sm:$0xff] %vm722_vm0, %v954_v30 }
  0xda   : > { %v1019_v58 = vpack.c.bf16 %v4955_v38, %v4925_v4  ;;  %v3094_v39 = vld [vmem:[%s4086_s6 + $0xdf] sm:$0x1]  ;;  %v3095_v56 = vld [vmem:[%s4086_s6 + $0xf1] sm:$0x1]  ;;  %v3096_v36 = vld [vmem:[%s4086_s6 + $0xf3] sm:$0x1]  ;;  %v647_v34 = vmax.f32 %v4894_v35, %v3092_v59  ;;  %v648_v21 = vmax.f32 %v4897_v25, %v3093_v45  ;;  %v707_v63 = vmax.f32 %v579_v26, %v643_v29 }
  0xdb   : > { %v3097_v7 = vld [vmem:[%s4086_s6 + $0xf5] sm:$0x1]  ;;  %v3098_v33 = vld [vmem:[%s4086_s6 + $0xf7] sm:$0x1]  ;;  %v3099_v16 = vld [vmem:[%s4086_s6 + $0xf9] sm:$0x1]  ;;  %v649_v31 = vmax.f32 %v4908_v43, %v3094_v39  ;;  %v650_v22 = vmax.f32 %v4911_v57, %v3095_v56  ;;  %v651_v52 = vmax.f32 %v4914_v62, %v3096_v36  ;;  %v708_v48 = vmax.f32 %v580_v24, %v644_v42 }
  0xdc   : > { %1029 = vrot.lane.b32.xlu0 %v1019_v58, %s3876_s24  ;;  %v3100_v40 = vld [vmem:[%s4086_s6 + $0xfb] sm:$0x1]  ;;  %v3101_v4 = vld [vmem:[%s4086_s6 + $0xfd] sm:$0x1]  ;;  %v3102_v35 = vld [vmem:[%s4086_s6 + $0xff] sm:$0x1]  ;;  %v652_v59 = vmax.f32 %v3033_v61, %v3097_v7  ;;  %v653_v25 = vmax.f32 %v3034_v0, %v3098_v33  ;;  %v654_v26 = vmax.f32 %v3035_v11, %v3099_v16  ;;  %v709_v29 = vmax.f32 %v581_v37, %v645_v54 }
  0xdd   : > { %v655_v30 = vmax.f32 %v3036_v46, %v3100_v40  ;;  %v656_v45 = vmax.f32 %v3037_v8, %v3101_v4  ;;  %v657_v13 = vmax.f32 %v3038_v9, %v3102_v35  ;;  %v5340_v43 = vmax.f32 %v4796_v12, %v4808_v17  ;;  %v3601_v40 = vld [vmem:[#allocation9 + $0x40] sm:$0xff]   ;;  %v5002_v58 = vld [vmem:[#allocation2 + $0x52] sm:$0xff] }
  0xde   : > { %v5341_v57 = vmax.f32 %v4773_v6, %v4782_v2  ;;  %v5342_v42 = vmax.f32 %v4799_v14, %v4811_v19  ;;  %v5343_v61 = vmax.f32 %v4802_v15, %v4814_v44  ;;  %v713_v37 = vmax.f32 %v585_v5, %v649_v31  ;;  %v3602_v12 = vld [vmem:[#allocation9] sm:$0xff]   ;;  %3226 = vmatprep.subr.bf16.mxu0 %v3601_v40  ;;  %v3603_v14 = vld [vmem:[#allocation9 + $0x48] sm:$0xff]   ;;  %v3606_v7 = vld [vmem:[#allocation9 + $0x10] sm:$0xff]  }
  0xdf   : > { %v710_v39 = vmax.f32 %v5340_v43, %v646_v23  ;;  %v715_v54 = vmax.f32 %v587_v49, %v651_v52  ;;  %v716_v4 = vmax.f32 %v588_v3, %v652_v59  ;;  %v717_v11 = vmax.f32 %v589_v18, %v653_v25  ;;  %3227 = vmatpush3.bf16.msra.mxu0 %v3602_v12  ;;  %v5000_v9 = vld [vmem:[#allocation2 + $0x42] sm:$0xff]  ;;  %v3608_v25 = vld [vmem:[#allocation9 + $0x18] sm:$0xff]  }
  0xe0   : > { %v706_v24 = vmax.f32 %v5341_v57, %v642_v50  ;;  %v711_v62 = vmax.f32 %v5342_v42, %v647_v34  ;;  %v712_v0 = vmax.f32 %v5343_v61, %v648_v21  ;;  %v718_v46 = vmax.f32 %v590_v1, %v654_v26  ;;  %3228 = vmatprep.subr.bf16.mxu0 %v3603_v14  ;;  %v3604_v1 = vld [vmem:[#allocation9 + $0x8] sm:$0xff]   ;;  %v3610_v43 = vld [vmem:[#allocation9 + $0x80] sm:$0xff]  }
  0xe1   : > { %v5344_v17 = vmax.f32 %v4821_v28, %v4833_v47  ;;  %v719_v2 = vmax.f32 %v591_v20, %v655_v30  ;;  %v720_v23 = vmax.f32 %v592_v51, %v656_v45  ;;  %v899_v50 = vrot.slane %v707_v63, 7  ;;  %v3609_v30 = vld [vmem:[#allocation9 + $0xc0] sm:$0xff]   ;;  %v3613_v61 = vld [vmem:[#allocation9 + $0xc8] sm:$0xff]  }
  0xe2   : > { %v721_v19 = vmax.f32 %v593_v10, %v657_v13  ;;  %v901_v8 = vrot.slane %v708_v48, 6  ;;  %v903_v15 = vrot.slane %v709_v29, 5  ;;  %v905_v44 = vrot.slane %v710_v39, 4  ;;  %v3605_v13 = vld [vmem:[#allocation9 + $0x50] sm:$0xff]   ;;  %3266 = vmatprep.subr.bf16.mxu1 %v3609_v30  ;;  %v3611_v57 = vld [vmem:[#allocation9 + $0x60] sm:$0xff]   ;;  %v3615_v40 = vld [vmem:[#allocation9 + $0x68] sm:$0xff]  }
  0xe3   : > { %v714_v6 = vmax.f32 %v5344_v17, %v650_v22  ;;  %v900_v5 = vsel %vm809_vm2, %v899_v50, %v706_v24  ;;  %v907_v49 = vrot.slane %v711_v62, 3  ;;  %v909_v3 = vrot.slane %v712_v0, 2  ;;  %3229 = vmatpush3.bf16.msra.mxu0 %v3604_v1  ;;  %v3607_v22 = vld [vmem:[#allocation9 + $0x58] sm:$0xff]   ;;  %3267 = vmatpush3.bf16.msra.mxu1 %v3610_v43  ;;  %v3612_v24 = vld [vmem:[#allocation9 + $0x20] sm:$0xff]   ;;  %v3614_v0 = vld [vmem:[#allocation9 + $0x88] sm:$0xff]  }
  0xe4   : > { %v913_v18 = vrot.slane %v715_v54, 7  ;;  %v902_v28 = vsel %vm812_vm3, %v901_v8, %v900_v5  ;;  %v915_v47 = vrot.slane %v716_v4, 6  ;;  %v917_v20 = vrot.slane %v717_v11, 5  ;;  %3230 = vmatprep.subr.bf16.mxu0 %v3605_v13  ;;  %v966_v42 = vld [vmem:[#allocation2 + $0x61] sm:$0xff]  ;;  %v1057_v62 = vld [vmem:[#allocation2 + $0x12] sm:$0xff]  ;;  %3268 = vmatprep.subr.bf16.mxu1 %v3613_v61 }
  0xe5   : > { %v919_v51 = vrot.slane %v718_v46, 4  ;;  %v904_v48 = vsel %vm815_vm4, %v903_v15, %v902_v28  ;;  %v911_v10 = vrot.slane %v713_v37, 1  ;;  %v921_v36 = vrot.slane %v719_v2, 3  ;;  %v5022_v37 = vld [vmem:[#allocation2 + $0x62] sm:$0xff]  ;;  %v3617_v2 = vld [vmem:[#allocation9 + $0xd0] sm:$0xff]  }
  0xe6   : > { %v914_v56 = vsel %vm809_vm2, %v913_v18, %v714_v6  ;;  %v906_v34 = vsel %vm818_vm5, %v905_v44, %v904_v48  ;;  %v923_v63 = vrot.slane %v720_v23, 2  ;;  %v925_v31 = vrot.slane %v721_v19, 1  ;;  %v993_v54 = vld [vmem:[#allocation2 + $0x2] sm:$0xff]  ;;  %v3618_v15 = vld [vmem:[#allocation9 + $0x90] sm:$0xff]   ;;  %v3624_v48 = vld [vmem:[#allocation9 + $0x38] sm:$0xff]  }
  0xe7   : > { %v916_v21 = vsel %vm812_vm3, %v915_v47, %v914_v56  ;;  %v908_v33 = vsel %vm821_vm6, %v907_v49, %v906_v34  ;;  %v1003_v52 = vpack.c.bf16 %v5002_v58, %v5000_v9  ;;  %3231 = vmatpush3.bf16.msra.mxu0 %v3606_v7  ;;  %3269 = vmatpush3.bf16.msra.mxu1 %v3614_v0  ;;  %v3616_v11 = vld [vmem:[#allocation9 + $0x28] sm:$0xff]   ;;  %v944_v44 = vld [vmem:[#allocation2] sm:$0xff]  ;;  %v945_v5 = vld [vmem:[#allocation2 + $0x10] sm:$0xff] }
  0xe8   : > { %v918_v16 = vsel %vm815_vm4, %v917_v20, %v916_v21  ;;  %v910_v35 = vsel %vm824_vm7, %v909_v3, %v908_v33  ;;  %3232 = vmatprep.subr.bf16.mxu0 %v3607_v22  ;;  %v1001_v4 = vpack.c.bf16 %v1057_v62, %v993_v54  ;;  %v1065_v8 = vpack.c.bf16 %v4756_v55, %v1057_v62  ;;  %v3620_v3 = vld [vmem:[#allocation9 + $0x30] sm:$0xff]   ;;  %v946_v18 = vld [vmem:[#allocation2 + $0x20] sm:$0xff]  ;;  %v3621_v47 = vld [vmem:[#allocation9 + $0xd8] sm:$0xff]  }
  0xe9   : > { %v920_v59 = vsel %vm818_vm5, %v919_v51, %v918_v16  ;;  %v912_v26 = vsel %vm827_vm8, %v911_v10, %v910_v35  ;;  %1007 = vst.msk [vmem:[#allocation3 + $0x58] sm:$0xff] %vm722_vm0, %v1003_v52  ;;  %1151 = vst.msk [vmem:[#allocation3 + $0x48] sm:$0xff] %vm722_vm0, %v1003_v52  ;;  %3270 = vmatprep.subr.bf16.mxu1 %v3617_v2  ;;  %v1051_v49 = vpack.c.bf16 %v966_v42, %v4927_v60  ;;  %v3622_v20 = vld [vmem:[#allocation9 + $0x98] sm:$0xff]   ;;  %v3626_v10 = vld [vmem:[#allocation9 + $0xa0] sm:$0xff]  }
  0xea   : > { %v922_v29 = vsel %vm821_vm6, %v921_v36, %v920_v59  ;;  %942 = vst.msk [vmem:[#allocation2 + $0x71] sm:$0xff] %vm722_vm0, %v912_v26  ;;  %1005 = vst.msk [vmem:[#allocation3 + $0x8] sm:$0xff] %vm722_vm0, %v1001_v4  ;;  %v952_v55 = vpack.c.bf16 %v945_v5, %v944_v44  ;;  %v1066_v1 = vpack.c.bf16 %v5000_v9, %v4758_v53  ;;  %v3623_v60 = vld [vmem:[#allocation9 + $0x78] sm:$0xff]   ;;  %v3625_v53 = vld [vmem:[#allocation9 + $0xe0] sm:$0xff]  }
  0xeb   : > { %v924_v45 = vsel %vm824_vm7, %v923_v63, %v922_v29  ;;  %3233 = vmatpush3.bf16.msra.mxu0 %v3608_v25  ;;  %3271 = vmatpush3.bf16.msra.mxu1 %v3618_v15  ;;  %v953_v28 = vpack.c.bf16 %v4695_v27, %v946_v18  ;;  %1055 = vst.msk [vmem:[#allocation3 + $0x60] sm:$0xff] %vm722_vm0, %v1051_v49  ;;  %v1113_v9 = vld [vmem:[#allocation2 + $0x91] sm:$0xff]  ;;  %v3628_v36 = vld [vmem:[#allocation9 + $0xe8] sm:$0xff]   ;;  %v5345_v33 = vld [vmem:[#allocation16_spill] sm:$0xff] }
  0xec   : > { %v926_v39 = vsel %vm827_vm8, %v925_v31, %v924_v45  ;;  %3234 = vmatprep.subr.bf16.mxu0 %v3611_v57  ;;  %956 = vst.msk [vmem:[#allocation3] sm:$0xff] %vm722_vm0, %v952_v55  ;;  %3272 = vmatprep.subr.bf16.mxu1 %v3621_v47  ;;  %v1067_v27 = vpack.c.bf16 %v5022_v37, %v5002_v58  ;;  %v3629_v58 = vld [vmem:[#allocation9 + $0xa8] sm:$0xff]   ;;  %v1091_v21 = vld [vmem:[#allocation2 + $0x30] sm:$0xff]  ;;  %v3633_v52 = vld [vmem:[#allocation9 + $0xf8] sm:$0xff]  }
  0xed   : > { %943 = vst.msk [vmem:[#allocation2 + $0x81] sm:$0xff] %vm722_vm0, %v926_v39  ;;  %957 = vst.msk [vmem:[#allocation3 + $0x28] sm:$0xff] %vm722_vm0, %v953_v28  ;;  %v1041_v63 = vld [vmem:[#allocation2 + $0x11] sm:$0xff]  ;;  %v1098_v7 = vpack.c.bf16 %v1091_v21, %v946_v18  ;;  %v1092_v35 = vld [vmem:[#allocation2 + $0x40] sm:$0xff] }
  0xee   : > { %v1049_v16 = vpack.c.bf16 %v5345_v33, %v1041_v63  ;;  %v3630_v31 = vld [vmem:[#allocation9 + $0xf0] sm:$0xff]   ;;  %v3634_v29 = vld [vmem:[#allocation9 + $0xb8] sm:$0xff]   ;;  %v5347_v30 = vld [vmem:[#allocation17_spill] sm:$0xff] }
  0xef   : > { %3235 = vmatpush3.bf16.msra.mxu0 %v3612_v24  ;;  %3273 = vmatpush3.bf16.msra.mxu1 %v3622_v20  ;;  %1102 = vst.msk [vmem:[#allocation3 + $0x18] sm:$0xff] %vm722_vm0, %v1098_v7  ;;  %v3631_v22 = vld [vmem:[#allocation9 + $0xb0] sm:$0xff]   ;;  %v3632_v0 = vld [vmem:[#allocation9 + $0x108] sm:$0xff]   ;;  %v3636_v54 = vld [vmem:[#allocation9 + $0x118] sm:$0xff]  }
  0xf0   : > { %3236 = vmatprep.subr.bf16.mxu0 %v3615_v40  ;;  %3274 = vmatprep.subr.bf16.mxu1 %v3625_v53  ;;  %1053 = vst.msk [vmem:[#allocation3 + $0x10] sm:$0xff] %vm722_vm0, %v1049_v16  ;;  %v5346_v59 = vld [vmem:[#allocation18_spill] sm:$0xff]  ;;  %v1158_v49 = vld [vmem:[#allocation3 + $0x20] sm:$0xff]  ;;  %v1163_v47 = vld [vmem:[#allocation3 + $0x48] sm:$0xff] }
  0xf1   : > { %v1015_v46 = vld [vmem:[#allocation2 + $0x70] sm:$0xff]  ;;  %v1099_v25 = vpack.c.bf16 %v5346_v59, %v1092_v35  ;;  %v3642_v21 = vld [vmem:[#allocation11 + $0x8] sm:$0xff]   ;;  %v3651_v35 = vld [vmem:[#allocation11 + $0xd8] sm:$0xff]  }
  0xf2   : > { %v5024_v12 = vld [vmem:[#allocation2 + $0x71] sm:$0xff]  ;;  %v955_v50 = vpack.c.bf16 %v1015_v46, %v4955_v38  ;;  %v3643_v63 = vld [vmem:[#allocation11 + $0xc8] sm:$0xff]   ;;  %v3652_v59 = vld [vmem:[#allocation11 + $0x60] sm:$0xff]  }
  0xf3   : > { %v5026_v17 = vld [vmem:[#allocation2 + $0x72] sm:$0xff]  ;;  %v5029_v6 = vpack.c.bf16 %v5024_v12, %v966_v42  ;;  %3237 = vmatpush3.bf16.msra.mxu0 %v3616_v11  ;;  %3275 = vmatpush3.bf16.msra.mxu1 %v3626_v10  ;;  %1103 = vst.msk [vmem:[#allocation3 + $0x40] sm:$0xff] %vm722_vm0, %v1099_v25  ;;  %v3645_v7 = vld [vmem:[#allocation11 + $0x88] sm:$0xff]  }
  0xf4   : > { %v1004_v23 = vpack.c.bf16 %v5026_v17, %v5022_v37  ;;  %v5035_v14 = vld [vmem:[#allocation2 + $0x80] sm:$0xff]  ;;  %959 = vst.msk [vmem:[#allocation3 + $0x78] sm:$0xff] %vm722_vm0, %v955_v50  ;;  %1104 = vst.msk [vmem:[#allocation3 + $0x68] sm:$0xff] %vm722_vm0, %v955_v50  ;;  %v3619_v38 = vld [vmem:[#allocation9 + $0x70] sm:$0xff]   ;;  %3276 = vmatprep.subr.bf16.mxu1 %v3628_v36 }
  0xf5   : > { %v1020_v19 = vpack.c.bf16 %v5035_v14, %v1015_v46  ;;  %982 = vrot.lane.b32.xlu1 %v5029_v6, %s3876_s24  ;;  %3238 = vmatprep.subr.bf16.mxu0 %v3619_v38  ;;  %v1112_v51 = vld [vmem:[#allocation2 + $0x81] sm:$0xff]  ;;  %v1043_v26 = vld [vmem:[#allocation2 + $0x31] sm:$0xff] }
  0xf6   : > { %1008 = vst.msk [vmem:[#allocation3 + $0x80] sm:$0xff] %vm722_vm0, %v1004_v23  ;;  %1152 = vst.msk [vmem:[#allocation3 + $0x70] sm:$0xff] %vm722_vm0, %v1004_v23  ;;  %v1064_v13 = vld [vmem:[#allocation2 + $0x82] sm:$0xff]  ;;  %v1052_v56 = vpack.c.bf16 %v1112_v51, %v5024_v12  ;;  %v1050_v45 = vpack.c.bf16 %v5347_v30, %v1043_v26  ;;  %v1097_v43 = vld [vmem:[#allocation2 + $0x90] sm:$0xff] }
  0xf7   : > { %1031 = vrot.lane.b32.xlu0 %v1020_v19, %s3876_s24  ;;  %3239 = vmatpush3.bf16.msra.mxu0 %v3620_v3  ;;  %v1068_v34 = vpack.c.bf16 %v1064_v13, %v5026_v17  ;;  %v1101_v39 = vpack.c.bf16 %v1097_v43, %v5035_v14  ;;  %v1145_v57 = vld [vmem:[#allocation2 + $0x92] sm:$0xff]  ;;  %v3639_v36 = vld [vmem:[#allocation11 + $0xc0] sm:$0xff]   ;;  %v3656_v30 = vld [vmem:[#allocation11 + $0x68] sm:$0xff]  }
  0xf8   : > { %3240 = vmatprep.subr.bf16.mxu0 %v3623_v60  ;;  %1056 = vst.msk [vmem:[#allocation3 + $0x88] sm:$0xff] %vm722_vm0, %v1052_v56  ;;  %3277 = vmatpush3.bf16.msra.mxu1 %v3629_v58  ;;  %1054 = vst.msk [vmem:[#allocation3 + $0x38] sm:$0xff] %vm722_vm0, %v1050_v45  ;;  %v1149_v24 = vpack.c.bf16 %v1145_v57, %v1064_v13  ;;  %v3635_v40 = vld [vmem:[#allocation9 + $0x110] sm:$0xff]   ;;  %v3638_v56 = vld [vmem:[#allocation11] sm:$0xff]  }
  0xf9   : > { %1073 = vrot.lane.b32.xlu1 %v1065_v8, %s3876_s24  ;;  %3278 = vmatprep.subr.bf16.mxu1 %v3630_v31  ;;  %1105 = vst.msk [vmem:[#allocation3 + $0x90] sm:$0xff] %vm722_vm0, %v1101_v39  ;;  %v3641_v58 = vld [vmem:[#allocation11 + $0x80] sm:$0xff]   ;;  %v3646_v33 = vld [vmem:[#allocation11 + $0x10] sm:$0xff]   ;;  %v3648_v31 = vld [vmem:[#allocation11 + $0x58] sm:$0xff]  }
  0xfa   : > { %1153 = vst.msk [vmem:[#allocation3 + $0x98] sm:$0xff] %vm722_vm0, %v1149_v24  ;;  %v3647_v16 = vld [vmem:[#allocation11 + $0xd0] sm:$0xff]   ;;  %v3653_v25 = vld [vmem:[#allocation11 + $0x98] sm:$0xff]   ;;  %v3654_v26 = vld [vmem:[#allocation11 + $0x20] sm:$0xff]  }
  0xfb   : > { %1122 = vrot.lane.b32.xlu0 %v4730_v41, %s3876_s24  ;;  %3241 = vmatpush3.bf16.msra.mxu0 %v3624_v48  ;;  %v3627_v41 = vld [vmem:[#allocation9 + $0x100] sm:$0xff]   ;;  %v3658_v43 = vld [vmem:[#allocation11 + $0x28] sm:$0xff]   ;;  %v3660_v57 = vld [vmem:[#allocation11 + $0x70] sm:$0xff]  }
  0xfc   : > { %3486 = vmatprep.subr.bf16.mxu0 %v3627_v41  ;;  %3279 = vmatpush3.bf16.msra.mxu1 %v3631_v22  ;;  %v3649_v22 = vld [vmem:[#allocation11 + $0x90] sm:$0xff]   ;;  %v3657_v45 = vld [vmem:[#allocation11 + $0xa0] sm:$0xff]   ;;  %v3659_v39 = vld [vmem:[#allocation11 + $0xe8] sm:$0xff]  }
  0xfd   : > { %1075 = vrot.lane.b32.xlu1 %v1066_v1, %s3876_s24  ;;  %3280 = vmatprep.subr.bf16.mxu1 %v3633_v52  ;;  %v3650_v52 = vld [vmem:[#allocation11 + $0x18] sm:$0xff]   ;;  %v3661_v24 = vld [vmem:[#allocation11 + $0xa8] sm:$0xff]  }
  0xff   : > { %1124 = vrot.lane.b32.xlu0 %v4943_v32, %s3876_s24  ;;  %v1117_v32 = vpack.c.bf16 %v1113_v9, %v1112_v51  ;;  %v1168_v51 = vld [vmem:[#allocation3 + $0x70] sm:$0xff] }
 0x100   : > { %3281 = vmatpush3.bf16.msra.mxu1 %v3634_v29  ;;  %v3655_v29 = vld [vmem:[#allocation11 + $0xe0] sm:$0xff]  }
 0x101   : > { %1077 = vrot.lane.b32.xlu1 %v1067_v27, %s3876_s24  ;;  %v1173_v27 = vld [vmem:[#allocation3 + $0x98] sm:$0xff] }
 0x103   : > { %1126 = vrot.lane.b32.xlu0 %v5029_v6, %s3876_s24 }
 0x105   : > { %1079 = vrot.lane.b32.xlu1 %v1068_v34, %s3876_s24  ;;  %v3640_v34 = vld [vmem:[#allocation11 + $0x48] sm:$0xff]  }
 0x107   : > { %1128 = vrot.lane.b32.xlu0 %v1117_v32, %s3876_s24  ;;  %v3644_v32 = vld [vmem:[#allocation11 + $0x50] sm:$0xff]   ;;  %s5266_s24 = scalar_lea.hbm %s5320_s5, %s3225_s13 }
 0x11a   : > { %v1026_v42 = vpop.permute.xlu0 %1025 }
 0x11b   : > { %1037 = vst.msk [vmem:[#allocation3 + $0x8] sm:$0xff] %vm988_vm9, %v1026_v42  ;;  %v3662_v42 = vld [vmem:[#allocation11 + $0x30] sm:$0xff]  }
 0x122   : > { %v1155_v62 = vld [vmem:[#allocation3 + $0x8] sm:$0xff] }
 0x123   : > { %1506 = vmatprep.mubr.bf16.mxu0 %v1155_v62  ;;  %v3663_v62 = vld [vmem:[#allocation11 + $0xf0] sm:$0xff]  }
 0x124   : > { %v977_v61 = vpop.permute.xlu0 %976 }
 0x125   : > { %989 = vst.msk [vmem:[#allocation3] sm:$0xff] %vm988_vm9, %v977_v61  ;;  %v3664_v61 = vld [vmem:[#allocation11 + $0x78] sm:$0xff]  }
 0x12c   : > { %v1154_v37 = vld [vmem:[#allocation3] sm:$0xff] }
 0x12d   : > { %1507 = vmatmul.mubr.bf16.vlgmr.msra.gmra.mrb[0].mxu0 %v1154_v37  ;;  %v3666_v37 = vld [vmem:[#allocation11 + $0x38] sm:$0xff]  }
 0x12e   : > { %3487 = vmatpush3.bf16.msra.mxu0 %v3627_v41  ;;  %v3637_v41 = vld [vmem:[#allocation11 + $0x40] sm:$0xff]  }
 0x12f   : > { %3488 = vmatprep.subr.bf16.mxu0 %v3632_v0  ;;  %3314 = vmatprep.subr.bf16.mxu1 %v3637_v41 }
 0x132   : > { %v1028_v4 = vpop.permute.xlu1 %1027  ;;  %3489 = vmatpush3.bf16.msra.mxu0 %v3632_v0  ;;  %v3665_v0 = vld [vmem:[#allocation11 + $0xb0] sm:$0xff]  }
 0x133   : > { %1038 = vst.msk [vmem:[#allocation3 + $0x30] sm:$0xff] %vm988_vm9, %v1028_v4  ;;  %3490 = vmatprep.subr.bf16.mxu0 %v3635_v40  ;;  %v3669_v4 = vld [vmem:[#allocation11 + $0x140] sm:$0xff]  }
 0x136   : > { %v979_v11 = vpop.permute.xlu1 %978  ;;  %3491 = vmatpush3.bf16.msra.mxu0 %v3635_v40  ;;  %v3667_v40 = vld [vmem:[#allocation11 + $0xf8] sm:$0xff]  }
 0x137   : > { %990 = vst.msk [vmem:[#allocation3 + $0x28] sm:$0xff] %vm988_vm9, %v979_v11  ;;  %3492 = vmatprep.subr.bf16.mxu0 %v3636_v54  ;;  %v3671_v11 = vld [vmem:[#allocation11 + $0x1c0] sm:$0xff]  }
 0x13a   : > { %v1160_v46 = vld [vmem:[#allocation3 + $0x30] sm:$0xff]  ;;  %3493 = vmatpush3.bf16.msra.mxu0 %v3636_v54  ;;  %v3668_v54 = vld [vmem:[#allocation11 + $0xb8] sm:$0xff]  }
 0x13b   : > { %1514 = vmatprep.mubr.bf16.mxu0 %v1160_v46  ;;  %3354 = vmatprep.subr.bf16.mxu0 %v3639_v36  ;;  %v5110_v36 = vld [vmem:[%s5317_s2] ss:$0 sm:$0xff] }
 0x13e   : > { %v1159_v12 = vld [vmem:[#allocation3 + $0x28] sm:$0xff] }
 0x13f   : > { %1515 = vmatmul.mubr.bf16.gmra.mrb[4].mxu0 %v1159_v12 }
 0x14b   : > { %v981_v17 = vpop.permute.xlu1 %980 }
 0x14c   : > { %991 = vst.msk [vmem:[#allocation3 + $0x50] sm:$0xff] %vm988_vm9, %v981_v17 }
 0x14e   : > { %v1030_v6 = vpop.permute.xlu0 %1029 }
 0x14f   : > { %1039 = vst.msk [vmem:[#allocation3 + $0x58] sm:$0xff] %vm988_vm9, %v1030_v6 }
 0x153   : > { %v1164_v2 = vld [vmem:[#allocation3 + $0x50] sm:$0xff] }
 0x156   : > { %v1165_v23 = vld [vmem:[#allocation3 + $0x58] sm:$0xff] }
 0x157   : > { %1522 = vmatprep.mubr.bf16.mxu0 %v1165_v23 }
 0x158   : > { %1523 = vmatmul.mubr.bf16.gmra.mrb[8].mxu0 %v1164_v2 }
 0x167   : > { %v983_v50 = vpop.permute.xlu1 %982 }
 0x168   : > { %992 = vst.msk [vmem:[#allocation3 + $0x78] sm:$0xff] %vm988_vm9, %v983_v50 }
 0x169   : > { %v1032_v14 = vpop.permute.xlu0 %1031 }
 0x16a   : > { %1040 = vst.msk [vmem:[#allocation3 + $0x80] sm:$0xff] %vm988_vm9, %v1032_v14 }
 0x16b   : > { %v1074_v19 = vpop.permute.xlu1 %1073 }
 0x16c   : > { %1085 = vst.msk [vmem:[#allocation3 + $0x10] sm:$0xff] %vm988_vm9, %v1074_v19 }
 0x16d   : > { %v1123_v8 = vpop.permute.xlu0 %1122 }
 0x16e   : > { %1134 = vst.msk [vmem:[#allocation3 + $0x18] sm:$0xff] %vm988_vm9, %v1123_v8 }
 0x16f   : > { %v1076_v15 = vpop.permute.xlu1 %1075  ;;  %v1169_v38 = vld [vmem:[#allocation3 + $0x78] sm:$0xff] }
 0x170   : > { %1086 = vst.msk [vmem:[#allocation3 + $0x38] sm:$0xff] %vm988_vm9, %v1076_v15 }
 0x171   : > { %v1125_v44 = vpop.permute.xlu0 %1124  ;;  %v1170_v5 = vld [vmem:[#allocation3 + $0x80] sm:$0xff] }
 0x172   : > { %1135 = vst.msk [vmem:[#allocation3 + $0x40] sm:$0xff] %vm988_vm9, %v1125_v44  ;;  %1530 = vmatprep.mubr.bf16.mxu0 %v1170_v5 }
 0x173   : > { %v1078_v55 = vpop.permute.xlu1 %1077  ;;  %1531 = vmatmul.mubr.bf16.gmra.mrb[12].mxu0 %v1169_v38  ;;  %v1156_v3 = vld [vmem:[#allocation3 + $0x10] sm:$0xff] }
 0x174   : > { %1087 = vst.msk [vmem:[#allocation3 + $0x60] sm:$0xff] %vm988_vm9, %v1078_v55  ;;  %3494 = vmatprep.mubr.msk.bf16.mxu0 %vm722_vm0, %v1158_v49 }
 0x175   : > { %v1157_v18 = vld [vmem:[#allocation3 + $0x18] sm:$0xff]  ;;  %v1127_v1 = vpop.permute.xlu0 %1126 }
 0x176   : > { %1571 = vmatprep.mubr.bf16.mxu1 %v1157_v18  ;;  %1136 = vst.msk [vmem:[#allocation3 + $0x68] sm:$0xff] %vm988_vm9, %v1127_v1 }
 0x177   : > { %1572 = vmatmul.mubr.bf16.vlgmr.msra.gmra.mrb[0].mxu1 %v1156_v3  ;;  %v1080_v28 = vpop.permute.xlu1 %1079  ;;  %v1161_v13 = vld [vmem:[#allocation3 + $0x38] sm:$0xff] }
 0x178   : > { %1088 = vst.msk [vmem:[#allocation3 + $0x88] sm:$0xff] %vm988_vm9, %v1080_v28  ;;  %3315 = vmatpush3.bf16.msra.mxu1 %v3638_v56 }
 0x179   : > { %v1162_v20 = vld [vmem:[#allocation3 + $0x40] sm:$0xff]  ;;  %v1129_v60 = vpop.permute.xlu0 %1128  ;;  %3316 = vmatprep.subr.bf16.mxu1 %v3640_v34 }
 0x17a   : > { %1579 = vmatprep.mubr.bf16.mxu1 %v1162_v20  ;;  %1137 = vst.msk [vmem:[#allocation3 + $0x90] sm:$0xff] %vm988_vm9, %v1129_v60 }
 0x17b   : > { %3495 = vmatmul.mubr.msk.bf16.vlgmr.msra.gmra.mrb[16].mxu0 %vm722_vm0, %v1163_v47  ;;  %v1166_v53 = vld [vmem:[#allocation3 + $0x60] sm:$0xff] }
 0x17c   : > { %3498 = vmatprep.mubr.msk.bf16.mxu0 %vm722_vm0, %v1168_v51  ;;  %3355 = vmatpush3.bf16.msra.mxu0 %v3641_v58 }
 0x17d   : > { %v1167_v48 = vld [vmem:[#allocation3 + $0x68] sm:$0xff]  ;;  %3317 = vmatpush3.bf16.msra.mxu1 %v3642_v21  ;;  %3356 = vmatprep.subr.bf16.mxu0 %v3643_v63 }
 0x17e   : > { %3318 = vmatprep.subr.bf16.mxu1 %v3644_v32  ;;  %v5115_v32 = vld [vmem:[%s5317_s2 + $0x1] ss:$0 sm:$0xff] }
 0x17f   : > { %1580 = vmatmul.mubr.bf16.gmra.mrb[4].mxu1 %v1161_v13  ;;  %v1171_v10 = vld [vmem:[#allocation3 + $0x88] sm:$0xff] }
 0x180   : > { %1587 = vmatprep.mubr.bf16.mxu1 %v1167_v48  ;;  %3357 = vmatpush3.bf16.msra.mxu0 %v3645_v7 }
 0x181   : > { %v1172_v9 = vld [vmem:[#allocation3 + $0x90] sm:$0xff]  ;;  %3319 = vmatpush3.bf16.msra.mxu1 %v3646_v33  ;;  %3358 = vmatprep.subr.bf16.mxu0 %v3647_v16 }
 0x182   : > { %3320 = vmatprep.subr.bf16.mxu1 %v3648_v31 }
 0x183   : > { %3499 = vmatmul.mubr.msk.bf16.gmra.mrb[20].mxu0 %vm722_vm0, %v1173_v27 }
 0x184   : > { %3359 = vmatpush3.bf16.msra.mxu0 %v3649_v22 }
 0x185   : > { %3321 = vmatpush3.bf16.msra.mxu1 %v3650_v52  ;;  %3360 = vmatprep.subr.bf16.mxu0 %v3651_v35 }
 0x186   : > { %3322 = vmatprep.subr.bf16.mxu1 %v3652_v59 }
 0x187   : > { %1588 = vmatmul.mubr.bf16.gmra.mrb[8].mxu1 %v1166_v53 }
 0x188   : > { %1595 = vmatprep.mubr.bf16.mxu1 %v1172_v9  ;;  %3361 = vmatpush3.bf16.msra.mxu0 %v3653_v25 }
 0x189   : > { %3323 = vmatpush3.bf16.msra.mxu1 %v3654_v26  ;;  %3362 = vmatprep.subr.bf16.mxu0 %v3655_v29  ;;  %v1748_v29 = vld [vmem:[#allocation4 + $0x1] sm:$0xff] }
 0x18a   : > { %3324 = vmatprep.subr.bf16.mxu1 %v3656_v30 }
 0x18c   : > { %3363 = vmatpush3.bf16.msra.mxu0 %v3657_v45 }
 0x18d   : > { %3325 = vmatpush3.bf16.msra.mxu1 %v3658_v43  ;;  %3364 = vmatprep.subr.bf16.mxu0 %v3659_v39 }
 0x18e   : > { %3326 = vmatprep.subr.bf16.mxu1 %v3660_v57 }
 0x18f   : > { %1596 = vmatmul.mubr.bf16.gmra.mrb[12].mxu1 %v1171_v10 }
 0x190   : > { %3365 = vmatpush3.bf16.msra.mxu0 %v3661_v24 }
 0x191   : > { %3327 = vmatpush3.bf16.msra.mxu1 %v3662_v42  ;;  %3366 = vmatprep.subr.bf16.mxu0 %v3663_v62 }
 0x192   : > { %3328 = vmatprep.subr.bf16.mxu1 %v3664_v61 }
 0x194   : > { %3367 = vmatpush3.bf16.msra.mxu0 %v3665_v0 }
 0x195   : > { %3329 = vmatpush3.bf16.msra.mxu1 %v3666_v37  ;;  %3368 = vmatprep.subr.bf16.mxu0 %v3667_v40 }
 0x196   : > { %3394 = vmatprep.subr.bf16.mxu1 %v3669_v4 }
 0x198   : > { %3369 = vmatpush3.bf16.msra.mxu0 %v3668_v54 }
 0x199   : > { %3434 = vmatprep.subr.bf16.mxu0 %v3671_v11 }
 0x200   : > { %v3242_v46 = vpop.f32.mrb[0].mxu0 }
 0x201   : > { %v3243_v12 = vpop.f32.mrb[1].mxu0 }
 0x202   : > { %v3244_v17 = vadd.f32 %v3243_v12, %v3242_v46  ;;  %v3245_v6 = vpop.f32.mrb[2].mxu0 }
 0x203   : > { %v3246_v2 = vpop.f32.mrb[3].mxu0 }
 0x204   : > { %v3247_v23 = vadd.f32 %v3246_v2, %v3245_v6 }
 0x212   : > { %v3248_v50 = vpop.f32.mrb[4].mxu0 }
 0x213   : > { %v3249_v14 = vpop.f32.mrb[5].mxu0 }
 0x214   : > { %v3250_v19 = vadd.f32 %v3249_v14, %v3248_v50  ;;  %v3251_v8 = vpop.f32.mrb[6].mxu0 }
 0x215   : > { %v3252_v15 = vpop.f32.mrb[7].mxu0 }
 0x216   : > { %v3253_v38 = vadd.f32 %v3252_v15, %v3251_v8 }
 0x22b   : > { %v3254_v44 = vpop.f32.mrb[8].mxu0 }
 0x22c   : > { %v3255_v5 = vpop.f32.mrb[9].mxu0 }
 0x22d   : > { %v5099_v49 = vadd.f32 %v3255_v5, %v3254_v44  ;;  %v3257_v55 = vpop.f32.mrb[10].mxu0  ;;  %v3670_v44 = vld [vmem:[#allocation11 + $0x100] sm:$0xff]  }
 0x22e   : > { %v3258_v3 = vpop.f32.mrb[11].mxu0 }
 0x22f   : > { %v5101_v18 = vadd.f32 %v3258_v3, %v3257_v55 }
 0x246   : > { %v3260_v1 = vpop.f32.mrb[12].mxu0 }
 0x247   : > { %v3261_v28 = vpop.f32.mrb[13].mxu0 }
 0x248   : > { %v5103_v47 = vadd.f32 %v3261_v28, %v3260_v1  ;;  %v3263_v20 = vpop.f32.mrb[14].mxu0  ;;  %v5145_v1 = vld [vmem:[#allocation4] sm:$0xff] }
 0x249   : > { %v3264_v60 = vpop.f32.mrb[15].mxu0 }
 0x24a   : > { %v3282_v51 = vpop.f32.mrb[0].mxu1  ;;  %v5105_v13 = vadd.f32 %v3264_v60, %v3263_v20  ;;  %v1764_v20 = vld [vmem:[#allocation4 + $0x2] sm:$0xff] }
 0x24b   : > { %v3283_v48 = vpop.f32.mrb[1].mxu1 }
 0x24c   : > { %v3284_v27 = vadd.f32 %v3283_v48, %v3282_v51  ;;  %v3285_v53 = vpop.f32.mrb[2].mxu1  ;;  %v3672_v51 = vld [vmem:[#allocation11 + $0x148] sm:$0xff]  }
 0x24d   : > { %v3286_v9 = vpop.f32.mrb[3].mxu1 }
 0x24e   : > { %v3287_v10 = vadd.f32 %v3286_v9, %v3285_v53  ;;  %v3496_v41 = vpop.f32.mrb[16].mxu0  ;;  %v1574_v56 = vadd.f32 %v3284_v27, %v3244_v17 }
 0x24f   : > { %v1638_v34 = vpop.f32.mrb[17].mxu0 }
 0x250   : > { %v1639_v58 = vadd.f32 %v1638_v34, %v1574_v56  ;;  %v3497_v21 = vpop.f32.mrb[18].mxu0  ;;  %v1577_v63 = vadd.f32 %v3287_v10, %v3247_v23  ;;  %v3673_v10 = vld [vmem:[#allocation11 + $0x180] sm:$0xff]   ;;  %v3674_v34 = vld [vmem:[#allocation11 + $0x108] sm:$0xff]  }
 0x251   : > { %v1641_v7 = vpop.f32.mrb[19].mxu0 }
 0x252   : > { %v3288_v33 = vpop.f32.mrb[4].mxu1  ;;  %v1674_v16 = vmul.f32 %v5110_v36, %v1639_v58  ;;  %v1642_v31 = vadd.f32 %v1641_v7, %v1577_v63  ;;  %v3675_v58 = vld [vmem:[#allocation11 + $0x1c8] sm:$0xff]  }
 0x253   : > { %v3289_v22 = vpop.f32.mrb[5].mxu1 }
 0x254   : > { %v3290_v52 = vadd.f32 %v3289_v22, %v3288_v33  ;;  %v3291_v35 = vpop.f32.mrb[6].mxu1  ;;  %v1687_v59 = vadd.f32 %v5115_v32, %v1674_v16  ;;  %v1675_v25 = vmul.f32 %v5110_v36, %v1642_v31  ;;  %v3676_v31 = vld [vmem:[#allocation11 + $0x150] sm:$0xff]  }
 0x255   : > { %v3292_v26 = vpop.f32.mrb[7].mxu1 }
 0x256   : > { %v3293_v30 = vadd.f32 %v3292_v26, %v3291_v35  ;;  %v1582_v45 = vadd.f32 %v3290_v52, %v3250_v19  ;;  %v5120_v43 = vmax.f32 %v1687_v59, 0.0  ;;  %v1688_v39 = vadd.f32 %v5115_v32, %v1675_v25  ;;  %v5123_v57 = vpop.f32.mrb[20].mxu0  ;;  %v3677_v26 = vld [vmem:[#allocation11 + $0x188] sm:$0xff]  }
 0x257   : > { %v1654_v24 = vpop.f32.mrb[21].mxu0 }
 0x258   : > { %v1647_v42 = vadd.f32 %v3496_v41, %v1582_v45  ;;  %1724 = vst [vmem:[#allocation4 + $0x11] sm:$0xff] %v5120_v43  ;;  %v1585_v62 = vadd.f32 %v3293_v30, %v3253_v38  ;;  %v5126_v61 = vmax.f32 %v1688_v39, 0.0  ;;  %v5128_v0 = vpop.f32.mrb[22].mxu0  ;;  %v1756_v37 = vpack.c.bf16 %v5120_v43, %v1748_v29  ;;  %v3678_v30 = vld [vmem:[#allocation11 + $0x110] sm:$0xff]  }
 0x259   : > { %v1657_v40 = vpop.f32.mrb[23].mxu0 }
 0x25a   : > { %v3294_v54 = vpop.f32.mrb[8].mxu1  ;;  %v1676_v4 = vmul.f32 %v5110_v36, %v1647_v42  ;;  %v1650_v11 = vadd.f32 %v3497_v21, %v1585_v62  ;;  %1725 = vst [vmem:[#allocation4 + $0x21] sm:$0xff] %v5126_v61  ;;  %2521 = vmatprep.mubr.bf16.mxu1 %v1756_v37  ;;  %v1804_v46 = vpack.c.bf16 %v5126_v61, %v5120_v43  ;;  %v3679_v62 = vld [vmem:[#allocation11 + $0x1d0] sm:$0xff]   ;;  %v3705_v43 = vld [vmem:[#allocation11 + $0x220] sm:$0xff]  }
 0x25b   : > { %v3295_v12 = vpop.f32.mrb[9].mxu1 }
 0x25c   : > { %v3296_v17 = vadd.f32 %v3295_v12, %v3294_v54  ;;  %v3297_v6 = vpop.f32.mrb[10].mxu1  ;;  %v1689_v2 = vadd.f32 %v5115_v32, %v1676_v4  ;;  %v1677_v23 = vmul.f32 %v5110_v36, %v1650_v11  ;;  %v3680_v54 = vld [vmem:[#allocation11 + $0x158] sm:$0xff]   ;;  %v3681_v12 = vld [vmem:[#allocation11 + $0x190] sm:$0xff]  }
 0x25d   : > { %v3298_v50 = vpop.f32.mrb[11].mxu1 }
 0x25e   : > { %v3299_v14 = vadd.f32 %v3298_v50, %v3297_v6  ;;  %v5137_v19 = vmax.f32 %v1689_v2, 0.0  ;;  %v1690_v8 = vadd.f32 %v5115_v32, %v1677_v23  ;;  %v1590_v15 = vadd.f32 %v3296_v17, %v5099_v49  ;;  %v3682_v6 = vld [vmem:[#allocation11 + $0x118] sm:$0xff]  }
 0x25f   : > { %v1733_v38 = vld [vmem:[#allocation4 + $0x10] sm:$0xff]  ;;  %v3683_v2 = vld [vmem:[#allocation11 + $0x1d8] sm:$0xff]  }
 0x260   : > { %1726 = vst [vmem:[#allocation4 + $0x31] sm:$0xff] %v5137_v19  ;;  %v5142_v5 = vmax.f32 %v1690_v8, 0.0  ;;  %v1655_v55 = vadd.f32 %v1654_v24, %v1590_v15  ;;  %v1593_v3 = vadd.f32 %v3299_v14, %v5101_v18  ;;  %v1740_v28 = vpack.c.bf16 %v1733_v38, %v5145_v1  ;;  %v5148_v60 = vld [vmem:[#allocation4 + $0x12] sm:$0xff]  ;;  %v3684_v14 = vld [vmem:[#allocation11 + $0x160] sm:$0xff]  }
 0x261   : > { %v5152_v49 = vpack.c.bf16 %v5137_v19, %v5126_v61  ;;  %v1781_v48 = vld [vmem:[#allocation4 + $0x20] sm:$0xff]  ;;  %v1772_v56 = vpack.c.bf16 %v5148_v60, %v1764_v20 }
 0x262   : > { %1727 = vst [vmem:[#allocation4 + $0x41] sm:$0xff] %v5142_v5  ;;  %v3300_v27 = vpop.f32.mrb[12].mxu1  ;;  %v1678_v53 = vmul.f32 %v5110_v36, %v1655_v55  ;;  %v1658_v9 = vadd.f32 %v1657_v40, %v1593_v3  ;;  %2522 = vmatmul.mubr.bf16.vlgmr.msra.gmra.mrb[16].mxu1 %v1740_v28  ;;  %v1788_v18 = vpack.c.bf16 %v1781_v48, %v1733_v38  ;;  %v5173_v42 = vld [vmem:[#allocation4 + $0x22] sm:$0xff]  ;;  %v3685_v38 = vld [vmem:[#allocation11 + $0x198] sm:$0xff]  }
 0x263   : > { %v3301_v41 = vpop.f32.mrb[13].mxu1  ;;  %3395 = vmatpush3.bf16.msra.mxu1 %v3670_v44  ;;  %2529 = vmatprep.mubr.bf16.mxu1 %v5152_v49  ;;  %v1805_v21 = vpack.c.bf16 %v5142_v5, %v5137_v19  ;;  %v3686_v55 = vld [vmem:[#allocation11 + $0x120] sm:$0xff]  }
 0x264   : > { %v3302_v63 = vadd.f32 %v3301_v41, %v3300_v27  ;;  %v3303_v7 = vpop.f32.mrb[14].mxu1  ;;  %v1691_v33 = vadd.f32 %v5115_v32, %v1678_v53  ;;  %v1679_v16 = vmul.f32 %v5110_v36, %v1658_v9  ;;  %2586 = vmatprep.mubr.bf16.mxu0 %v1788_v18  ;;  %3396 = vmatprep.subr.bf16.mxu1 %v3672_v51  ;;  %v3689_v9 = vld [vmem:[#allocation11 + $0x1a0] sm:$0xff]   ;;  %v3691_v41 = vld [vmem:[#allocation11 + $0x1e8] sm:$0xff]  }
 0x265   : > { %v3304_v22 = vpop.f32.mrb[15].mxu1  ;;  %2587 = vmatmul.mubr.bf16.vlgmr.msra.gmra.mrb[24].mxu0 %v1772_v56 }
 0x266   : > { %v3305_v52 = vadd.f32 %v3304_v22, %v3303_v7  ;;  %v1598_v35 = vadd.f32 %v3302_v63, %v5103_v47  ;;  %v5163_v59 = vmax.f32 %v1691_v33, 0.0  ;;  %v1692_v25 = vadd.f32 %v5115_v32, %v1679_v16  ;;  %3435 = vmatpush3.bf16.msra.mxu0 %v3673_v10  ;;  %v3690_v10 = vld [vmem:[#allocation11 + $0x128] sm:$0xff]   ;;  %v3694_v7 = vld [vmem:[#allocation11 + $0x130] sm:$0xff]  }
 0x267   : > { %v1782_v29 = vld [vmem:[#allocation4 + $0x30] sm:$0xff]  ;;  %3397 = vmatpush3.bf16.msra.mxu1 %v3674_v34  ;;  %3436 = vmatprep.subr.bf16.mxu0 %v3675_v58  ;;  %v3693_v58 = vld [vmem:[#allocation11 + $0x1a8] sm:$0xff]  }
 0x268   : > { %v1663_v45 = vadd.f32 %v5123_v57, %v1598_v35  ;;  %1728 = vst [vmem:[#allocation4 + $0x51] sm:$0xff] %v5163_v59  ;;  %v1601_v39 = vadd.f32 %v3305_v52, %v5105_v13  ;;  %v5169_v24 = vmax.f32 %v1692_v25, 0.0  ;;  %3398 = vmatprep.subr.bf16.mxu1 %v3676_v31  ;;  %v5171_v47 = vpack.c.bf16 %v1782_v29, %v1781_v48  ;;  %v5183_v11 = vld [vmem:[#allocation4 + $0x32] sm:$0xff]  ;;  %v3688_v48 = vld [vmem:[#allocation11 + $0x168] sm:$0xff]  }
 0x269   : > { %v1783_v37 = vld [vmem:[#allocation4 + $0x40] sm:$0xff]  ;;  %v5177_v40 = vpack.c.bf16 %v5163_v59, %v5142_v5  ;;  %v5188_v17 = vpack.c.bf16 %v5183_v11, %v5173_v42  ;;  %v3692_v34 = vld [vmem:[#allocation11 + $0x170] sm:$0xff]   ;;  %v1820_v35 = vpack.c.bf16 %v5173_v42, %v5148_v60  ;;  %v3696_v25 = vld [vmem:[#allocation11 + $0x178] sm:$0xff]  }
 0x26a   : > { %v1680_v57 = vmul.f32 %v5110_v36, %v1663_v45  ;;  %v1666_v4 = vadd.f32 %v5128_v0, %v1601_v39  ;;  %1729 = vst [vmem:[#allocation4 + $0x61] sm:$0xff] %v5169_v24  ;;  %v1789_v13 = vpack.c.bf16 %v1783_v37, %v1782_v29  ;;  %3437 = vmatpush3.bf16.msra.mxu0 %v3677_v26  ;;  %v1768_v53 = vld [vmem:[#allocation4 + $0x42] sm:$0xff]  ;;  %v3695_v22 = vld [vmem:[#allocation11 + $0x1f0] sm:$0xff]   ;;  %v3698_v45 = vld [vmem:[#allocation11 + $0x138] sm:$0xff]  }
 0x26b   : > { %2530 = vmatmul.mubr.bf16.gmra.mrb[20].mxu1 %v5171_v47  ;;  %v1806_v0 = vpack.c.bf16 %v5169_v24, %v5163_v59  ;;  %3438 = vmatprep.subr.bf16.mxu0 %v3679_v62  ;;  %v3697_v29 = vld [vmem:[#allocation11 + $0x1b0] sm:$0xff]   ;;  %v3699_v39 = vld [vmem:[#allocation11 + $0x1f8] sm:$0xff]   ;;  %v3701_v62 = vld [vmem:[#allocation11 + $0x200] sm:$0xff]  }
 0x26c   : > { %3399 = vmatpush3.bf16.msra.mxu1 %v3678_v30  ;;  %2537 = vmatprep.mubr.bf16.mxu1 %v5177_v40  ;;  %v1693_v23 = vadd.f32 %v5115_v32, %v1680_v57  ;;  %v1681_v50 = vmul.f32 %v5110_v36, %v1666_v4  ;;  %v3700_v60 = vld [vmem:[#allocation11 + $0x1b8] sm:$0xff]   ;;  %v3702_v42 = vld [vmem:[#allocation11 + $0x208] sm:$0xff]   ;;  %v3707_v5 = vld [vmem:[#allocation11 + $0x230] sm:$0xff]  }
 0x26d   : > { %2594 = vmatprep.mubr.bf16.mxu0 %v1789_v13  ;;  %3400 = vmatprep.subr.bf16.mxu1 %v3680_v54  ;;  %v3703_v54 = vld [vmem:[#allocation11 + $0x210] sm:$0xff]  }
 0x26e   : > { %2595 = vmatmul.mubr.bf16.gmra.mrb[28].mxu0 %v5188_v17  ;;  %v5195_v8 = vmax.f32 %v1693_v23, 0.0  ;;  %v1694_v15 = vadd.f32 %v5115_v32, %v1681_v50  ;;  %v3687_v32 = vld [vmem:[#allocation11 + $0x1e0] sm:$0xff]  }
 0x26f   : > { %3439 = vmatpush3.bf16.msra.mxu0 %v3681_v12  ;;  %v1784_v44 = vld [vmem:[#allocation4 + $0x50] sm:$0xff] }
 0x270   : > { %3401 = vmatpush3.bf16.msra.mxu1 %v3682_v6  ;;  %3440 = vmatprep.subr.bf16.mxu0 %v3683_v2  ;;  %1730 = vst [vmem:[#allocation4 + $0x71] sm:$0xff] %v5195_v8  ;;  %v5199_v3 = vmax.f32 %v1694_v15, 0.0  ;;  %v5201_v36 = vpack.c.bf16 %v1784_v44, %v1783_v37  ;;  %v5205_v28 = vpack.c.bf16 %v5195_v8, %v5169_v24  ;;  %v5207_v20 = vld [vmem:[#allocation4 + $0x52] sm:$0xff] }
 0x271   : > { %3402 = vmatprep.subr.bf16.mxu1 %v3684_v14  ;;  %v1785_v51 = vld [vmem:[#allocation4 + $0x60] sm:$0xff]  ;;  %v5213_v18 = vpack.c.bf16 %v5207_v20, %v1768_v53  ;;  %v1821_v37 = vpack.c.bf16 %v1768_v53, %v5183_v11  ;;  %v1868_v24 = vld [vmem:[#allocation4 + $0x92] sm:$0xff] }
 0x272   : > { %1731 = vst [vmem:[#allocation4 + $0x81] sm:$0xff] %v5199_v3  ;;  %v1790_v27 = vpack.c.bf16 %v1785_v51, %v1784_v44  ;;  %v1807_v56 = vpack.c.bf16 %v5199_v3, %v5195_v8  ;;  %v1770_v16 = vld [vmem:[#allocation4 + $0x62] sm:$0xff] }
 0x273   : > { %3441 = vmatpush3.bf16.msra.mxu0 %v3685_v38  ;;  %2538 = vmatmul.mubr.bf16.gmra.mrb[24].mxu1 %v5201_v36  ;;  %v1822_v57 = vpack.c.bf16 %v1770_v16, %v5207_v20 }
 0x274   : > { %3403 = vmatpush3.bf16.msra.mxu1 %v3686_v55  ;;  %2545 = vmatprep.mubr.bf16.mxu1 %v5205_v28 }
 0x275   : > { %2602 = vmatprep.mubr.bf16.mxu0 %v1790_v27  ;;  %3442 = vmatprep.subr.bf16.mxu0 %v3687_v32 }
 0x276   : > { %2603 = vmatmul.mubr.bf16.gmra.mrb[32].mxu0 %v5213_v18  ;;  %3404 = vmatprep.subr.bf16.mxu1 %v3688_v48 }
 0x277   : > { %3443 = vmatpush3.bf16.msra.mxu0 %v3689_v9  ;;  %v1786_v63 = vld [vmem:[#allocation4 + $0x70] sm:$0xff] }
 0x278   : > { %3405 = vmatpush3.bf16.msra.mxu1 %v3690_v10  ;;  %3444 = vmatprep.subr.bf16.mxu0 %v3691_v41  ;;  %v1743_v33 = vpack.c.bf16 %v1786_v63, %v1785_v51  ;;  %v1771_v31 = vld [vmem:[#allocation4 + $0x72] sm:$0xff] }
 0x279   : > { %3406 = vmatprep.subr.bf16.mxu1 %v3692_v34  ;;  %v5218_v52 = vld [vmem:[#allocation4 + $0x80] sm:$0xff]  ;;  %v1775_v30 = vpack.c.bf16 %v1771_v31, %v1770_v16 }
 0x27a   : > { %v1791_v26 = vpack.c.bf16 %v5218_v52, %v1786_v63  ;;  %v1819_v61 = vld [vmem:[#allocation4 + $0x82] sm:$0xff]  ;;  %v1840_v59 = vpack.c.bf16 %v5145_v1, %v5218_v52 }
 0x27b   : > { %3445 = vmatpush3.bf16.msra.mxu0 %v3693_v58  ;;  %2546 = vmatmul.mubr.bf16.gmra.mrb[28].mxu1 %v1743_v33  ;;  %v1872_v4 = vpack.c.bf16 %v1868_v24, %v1819_v61 }
 0x27c   : > { %3407 = vmatpush3.bf16.msra.mxu1 %v3694_v7  ;;  %2651 = vmatprep.mubr.bf16.mxu1 %v1820_v35 }
 0x27d   : > { %2610 = vmatprep.mubr.bf16.mxu0 %v1791_v26  ;;  %3446 = vmatprep.subr.bf16.mxu0 %v3695_v22 }
 0x27e   : > { %2611 = vmatmul.mubr.bf16.gmra.mrb[36].mxu0 %v1775_v30  ;;  %3408 = vmatprep.subr.bf16.mxu1 %v3696_v25 }
 0x27f   : > { %3447 = vmatpush3.bf16.msra.mxu0 %v3697_v29  ;;  %2716 = vmatprep.mubr.bf16.mxu0 %v5152_v49  ;;  %v3704_v49 = vld [vmem:[#allocation11 + $0x218] sm:$0xff]  }
 0x280   : > { %3409 = vmatpush3.bf16.msra.mxu1 %v3698_v45  ;;  %3448 = vmatprep.subr.bf16.mxu0 %v3699_v39 }
 0x281   : > { %3502 = vmatprep.subr.bf16.mxu1 %v3701_v62 }
 0x283   : > { %3449 = vmatpush3.bf16.msra.mxu0 %v3700_v60  ;;  %2652 = vmatmul.mubr.bf16.vlgmr.msra.gmra.mrb[32].mxu1 %v1804_v46  ;;  %v3706_v46 = vld [vmem:[#allocation11 + $0x228] sm:$0xff]  }
 0x284   : > { %3503 = vmatpush3.bf16.msra.mxu1 %v3701_v62  ;;  %2659 = vmatprep.mubr.bf16.mxu1 %v1821_v37 }
 0x285   : > { %3504 = vmatprep.subr.bf16.mxu1 %v3702_v42 }
 0x286   : > { %2717 = vmatmul.mubr.bf16.vlgmr.msra.gmra.mrb[40].mxu0 %v5171_v47  ;;  %v1823_v47 = vpack.c.bf16 %v1819_v61, %v1771_v31 }
 0x287   : > { %2724 = vmatprep.mubr.bf16.mxu0 %v5177_v40  ;;  %v1852_v40 = vld [vmem:[#allocation4 + $0x91] sm:$0xff] }
 0x288   : > { %3505 = vmatpush3.bf16.msra.mxu1 %v3702_v42  ;;  %v1856_v19 = vpack.c.bf16 %v1852_v40, %v5199_v3 }
 0x289   : > { %3506 = vmatprep.subr.bf16.mxu1 %v3703_v54 }
 0x28b   : > { %2660 = vmatmul.mubr.bf16.gmra.mrb[36].mxu1 %v1805_v21  ;;  %v3708_v21 = vld [vmem:[#allocation11 + $0x238] sm:$0xff]  }
 0x28c   : > { %3507 = vmatpush3.bf16.msra.mxu1 %v3703_v54  ;;  %2667 = vmatprep.mubr.bf16.mxu1 %v1822_v57 }
 0x28d   : > { %3508 = vmatprep.subr.bf16.mxu1 %v3704_v49 }
 0x28e   : > { %2725 = vmatmul.mubr.bf16.gmra.mrb[44].mxu0 %v5201_v36 }
 0x28f   : > { %2732 = vmatprep.mubr.bf16.mxu0 %v5205_v28 }
 0x290   : > { %3509 = vmatpush3.bf16.msra.mxu1 %v3704_v49 }
 0x291   : > { %3510 = vmatprep.subr.bf16.mxu1 %v3705_v43 }
 0x293   : > { %2668 = vmatmul.mubr.bf16.gmra.mrb[40].mxu1 %v1806_v0 }
 0x294   : > { %3511 = vmatpush3.bf16.msra.mxu1 %v3705_v43  ;;  %2675 = vmatprep.mubr.bf16.mxu1 %v1823_v47 }
 0x295   : > { %3512 = vmatprep.subr.bf16.mxu1 %v3706_v46 }
 0x296   : > { %2733 = vmatmul.mubr.bf16.gmra.mrb[48].mxu0 %v1743_v33 }
 0x297   : > { %2740 = vmatprep.mubr.bf16.mxu0 %v1856_v19 }
 0x298   : > { %3513 = vmatpush3.bf16.msra.mxu1 %v3706_v46 }
 0x299   : > { %3514 = vmatprep.subr.bf16.mxu1 %v3707_v5 }
 0x29b   : > { %2676 = vmatmul.mubr.bf16.gmra.mrb[44].mxu1 %v1807_v56 }
 0x29c   : > { %3515 = vmatpush3.bf16.msra.mxu1 %v3707_v5  ;;  %3518 = vmatprep.mubr.bf16.mxu1 %v5188_v17 }
 0x29d   : > { %3516 = vmatprep.subr.bf16.mxu1 %v3708_v21 }
 0x29e   : > { %2741 = vmatmul.mubr.bf16.gmra.mrb[52].mxu0 %v1840_v59 }
 0x2a0   : > { %3517 = vmatpush3.bf16.msra.mxu1 %v3708_v21 }
 0x2a3   : > { %3519 = vmatmul.mubr.bf16.vlgmr.msra.gmra.mrb[48].mxu1 %v5213_v18 }
 0x2a4   : > { %3522 = vmatprep.mubr.bf16.mxu1 %v1775_v30 }
 0x2ab   : > { %3523 = vmatmul.mubr.bf16.gmra.mrb[52].mxu1 %v1872_v4 }
 0x335   : > { %v3330_v13 = vpop.f32.mrb[16].mxu1 }
 0x336   : > { %v3331_v11 = vpop.f32.mrb[17].mxu1 }
 0x337   : > { %v3332_v12 = vadd.f32 %v3331_v11, %v3330_v13  ;;  %v3333_v6 = vpop.f32.mrb[18].mxu1 }
 0x338   : > { %v3370_v2 = vpop.f32.mrb[24].mxu0  ;;  %v3334_v0 = vpop.f32.mrb[19].mxu1 }
 0x339   : > { %v3335_v23 = vadd.f32 %v3334_v0, %v3333_v6  ;;  %v3371_v17 = vpop.f32.mrb[25].mxu0 }
 0x33a   : > { %v3372_v50 = vadd.f32 %v3371_v17, %v3370_v2  ;;  %v3373_v14 = vpop.f32.mrb[26].mxu0 }
 0x33b   : > { %v3374_v1 = vpop.f32.mrb[27].mxu0 }
 0x33c   : > { %v2589_v8 = vadd.f32 %v3372_v50, %v3332_v12  ;;  %v3375_v15 = vadd.f32 %v3374_v1, %v3373_v14 }
 0x33e   : > { %v3336_v38 = vpop.f32.mrb[20].mxu1  ;;  %v2592_v44 = vadd.f32 %v3375_v15, %v3335_v23 }
 0x33f   : > { %v3337_v55 = vpop.f32.mrb[21].mxu1 }
 0x340   : > { %v3338_v3 = vadd.f32 %v3337_v55, %v3336_v38  ;;  %v3339_v36 = vpop.f32.mrb[22].mxu1 }
 0x341   : > { %v3376_v28 = vpop.f32.mrb[28].mxu0  ;;  %v3340_v20 = vpop.f32.mrb[23].mxu1 }
 0x342   : > { %v3341_v32 = vadd.f32 %v3340_v20, %v3339_v36  ;;  %v3377_v51 = vpop.f32.mrb[29].mxu0 }
 0x343   : > { %v3378_v48 = vadd.f32 %v3377_v51, %v3376_v28  ;;  %v3379_v27 = vpop.f32.mrb[30].mxu0 }
 0x344   : > { %v3380_v53 = vpop.f32.mrb[31].mxu0 }
 0x345   : > { %v2597_v9 = vadd.f32 %v3378_v48, %v3338_v3  ;;  %v3381_v18 = vadd.f32 %v3380_v53, %v3379_v27 }
 0x346   : > { %v3342_v10 = vpop.f32.mrb[24].mxu1 }
 0x347   : > { %v2600_v41 = vadd.f32 %v3381_v18, %v3341_v32  ;;  %v3343_v56 = vpop.f32.mrb[25].mxu1 }
 0x348   : > { %v3344_v34 = vadd.f32 %v3343_v56, %v3342_v10  ;;  %v3345_v58 = vpop.f32.mrb[26].mxu1 }
 0x349   : > { %v3382_v63 = vpop.f32.mrb[32].mxu0  ;;  %v3346_v7 = vpop.f32.mrb[27].mxu1 }
 0x34a   : > { %v3347_v33 = vadd.f32 %v3346_v7, %v3345_v58  ;;  %v3383_v16 = vpop.f32.mrb[33].mxu0 }
 0x34b   : > { %v3384_v31 = vadd.f32 %v3383_v16, %v3382_v63  ;;  %v3385_v22 = vpop.f32.mrb[34].mxu0 }
 0x34c   : > { %v3386_v52 = vpop.f32.mrb[35].mxu0 }
 0x34d   : > { %v2605_v35 = vadd.f32 %v3384_v31, %v3344_v34  ;;  %v3387_v25 = vadd.f32 %v3386_v52, %v3385_v22 }
 0x34e   : > { %v3348_v26 = vpop.f32.mrb[28].mxu1 }
 0x34f   : > { %v2608_v29 = vadd.f32 %v3387_v25, %v3347_v33  ;;  %v3349_v30 = vpop.f32.mrb[29].mxu1 }
 0x350   : > { %v3350_v45 = vadd.f32 %v3349_v30, %v3348_v26  ;;  %v3351_v39 = vpop.f32.mrb[30].mxu1 }
 0x351   : > { %v3388_v62 = vpop.f32.mrb[36].mxu0  ;;  %v3352_v60 = vpop.f32.mrb[31].mxu1 }
 0x352   : > { %v3353_v42 = vadd.f32 %v3352_v60, %v3351_v39  ;;  %v3389_v37 = vpop.f32.mrb[37].mxu0 }
 0x353   : > { %v3390_v54 = vadd.f32 %v3389_v37, %v3388_v62  ;;  %v3391_v49 = vpop.f32.mrb[38].mxu0 }
 0x354   : > { %v3392_v57 = vpop.f32.mrb[39].mxu0 }
 0x355   : > { %v2613_v43 = vadd.f32 %v3390_v54, %v3350_v45  ;;  %v3393_v61 = vadd.f32 %v3392_v57, %v3391_v49 }
 0x356   : > { %v3410_v46 = vpop.f32.mrb[32].mxu1 }
 0x357   : > { %v2616_v47 = vadd.f32 %v3393_v61, %v3353_v42  ;;  %v3411_v40 = vpop.f32.mrb[33].mxu1 }
 0x358   : > { %v3412_v19 = vadd.f32 %v3411_v40, %v3410_v46  ;;  %v3413_v5 = vpop.f32.mrb[34].mxu1 }
 0x359   : > { %v3450_v21 = vpop.f32.mrb[40].mxu0  ;;  %v3414_v59 = vpop.f32.mrb[35].mxu1 }
 0x35a   : > { %v2654_v24 = vadd.f32 %v3412_v19, %v2589_v8  ;;  %v3415_v4 = vadd.f32 %v3414_v59, %v3413_v5  ;;  %v3451_v13 = vpop.f32.mrb[41].mxu0  ;;  %v3217_v19 = vld [vmem:[%s5319_s4] ss:$0 sm:$0xff] }
 0x35b   : > { %v3452_v11 = vadd.f32 %v3451_v13, %v3450_v21  ;;  %v3453_v12 = vpop.f32.mrb[42].mxu0 }
 0x35c   : > { %v2657_v6 = vadd.f32 %v3415_v4, %v2592_v44  ;;  %v3454_v2 = vpop.f32.mrb[43].mxu0 }
 0x35d   : > { %v3455_v0 = vadd.f32 %v3454_v2, %v3453_v12  ;;  %v2719_v23 = vadd.f32 %v3452_v11, %v2654_v24 }
 0x35e   : > { %v3416_v17 = vpop.f32.mrb[36].mxu1 }
 0x35f   : > { %v3417_v50 = vpop.f32.mrb[37].mxu1  ;;  %v2722_v14 = vadd.f32 %v3455_v0, %v2657_v6 }
 0x360   : > { %v3418_v1 = vadd.f32 %v3417_v50, %v3416_v17  ;;  %v3419_v15 = vpop.f32.mrb[38].mxu1 }
 0x361   : > { %v3456_v38 = vpop.f32.mrb[44].mxu0  ;;  %v3420_v55 = vpop.f32.mrb[39].mxu1 }
 0x362   : > { %v2662_v3 = vadd.f32 %v3418_v1, %v2597_v9  ;;  %v3421_v36 = vadd.f32 %v3420_v55, %v3419_v15  ;;  %v3457_v28 = vpop.f32.mrb[45].mxu0 }
 0x363   : > { %v3458_v20 = vadd.f32 %v3457_v28, %v3456_v38  ;;  %v3459_v8 = vpop.f32.mrb[46].mxu0 }
 0x364   : > { %v2665_v32 = vadd.f32 %v3421_v36, %v2600_v41  ;;  %v3460_v51 = vpop.f32.mrb[47].mxu0 }
 0x365   : > { %v3461_v48 = vadd.f32 %v3460_v51, %v3459_v8  ;;  %v2727_v27 = vadd.f32 %v3458_v20, %v2662_v3 }
 0x366   : > { %v3422_v44 = vpop.f32.mrb[40].mxu1 }
 0x367   : > { %v3423_v53 = vpop.f32.mrb[41].mxu1  ;;  %v2730_v18 = vadd.f32 %v3461_v48, %v2665_v32 }
 0x368   : > { %v3424_v10 = vadd.f32 %v3423_v53, %v3422_v44  ;;  %v3425_v56 = vpop.f32.mrb[42].mxu1 }
 0x369   : > { %v3462_v34 = vpop.f32.mrb[48].mxu0  ;;  %v3426_v58 = vpop.f32.mrb[43].mxu1 }
 0x36a   : > { %v2670_v63 = vadd.f32 %v3424_v10, %v2605_v35  ;;  %v3427_v7 = vadd.f32 %v3426_v58, %v3425_v56  ;;  %v3463_v33 = vpop.f32.mrb[49].mxu0 }
 0x36b   : > { %v3464_v16 = vadd.f32 %v3463_v33, %v3462_v34  ;;  %v3465_v9 = vpop.f32.mrb[50].mxu0 }
 0x36c   : > { %v2673_v31 = vadd.f32 %v3427_v7, %v2608_v29  ;;  %v3466_v22 = vpop.f32.mrb[51].mxu0 }
 0x36d   : > { %v3467_v52 = vadd.f32 %v3466_v22, %v3465_v9  ;;  %v2735_v25 = vadd.f32 %v3464_v16, %v2670_v63 }
 0x36e   : > { %v3428_v41 = vpop.f32.mrb[44].mxu1 }
 0x36f   : > { %v3429_v26 = vpop.f32.mrb[45].mxu1  ;;  %v2738_v30 = vadd.f32 %v3467_v52, %v2673_v31 }
 0x370   : > { %v3430_v45 = vadd.f32 %v3429_v26, %v3428_v41  ;;  %v3431_v39 = vpop.f32.mrb[46].mxu1 }
 0x371   : > { %v3468_v62 = vpop.f32.mrb[52].mxu0  ;;  %v3432_v60 = vpop.f32.mrb[47].mxu1 }
 0x372   : > { %v2678_v42 = vadd.f32 %v3430_v45, %v2613_v43  ;;  %v3433_v37 = vadd.f32 %v3432_v60, %v3431_v39  ;;  %v3469_v54 = vpop.f32.mrb[53].mxu0  ;;  %v3218_v43 = vld [vmem:[%s5319_s4 + $0x1] ss:$0 sm:$0xff] }
 0x373   : > { %v3470_v35 = vadd.f32 %v3469_v54, %v3468_v62  ;;  %v3471_v49 = vpop.f32.mrb[54].mxu0 }
 0x374   : > { %v2681_v57 = vadd.f32 %v3433_v37, %v2616_v47  ;;  %v3472_v61 = vpop.f32.mrb[55].mxu0 }
 0x375   : > { %v3473_v46 = vadd.f32 %v3472_v61, %v3471_v49  ;;  %v2743_v29 = vadd.f32 %v3470_v35, %v2678_v42 }
 0x376   : > { %v3520_v40 = vpop.f32.mrb[48].mxu1 }
 0x377   : > { %v2792_v5 = vadd.f32 %v3520_v40, %v2727_v27  ;;  %v2783_v21 = vpop.f32.mrb[49].mxu1  ;;  %v2746_v59 = vadd.f32 %v3473_v46, %v2681_v57 }
 0x378   : > { %v2784_v24 = vadd.f32 %v2783_v21, %v2719_v23  ;;  %v3521_v4 = vpop.f32.mrb[50].mxu1 }
 0x379   : > { %v2821_v13 = vmul.f32 %v3217_v19, %v2792_v5  ;;  %v2795_v47 = vadd.f32 %v3521_v4, %v2730_v18  ;;  %v2786_v11 = vpop.f32.mrb[51].mxu1 }
 0x37a   : > { %v2819_v12 = vmul.f32 %v3217_v19, %v2784_v24  ;;  %v2787_v6 = vadd.f32 %v2786_v11, %v2722_v14 }
 0x37b   : > { %v2834_v2 = vadd.f32 %v3218_v43, %v2821_v13  ;;  %v2822_v0 = vmul.f32 %v3217_v19, %v2795_v47 }
 0x37c   : > { %v2832_v17 = vadd.f32 %v3218_v43, %v2819_v12  ;;  %v2820_v50 = vmul.f32 %v3217_v19, %v2787_v6 }
 0x37d   : > { %v2842_v1 = vmax.f32 %v2834_v2, 0.0  ;;  %v2835_v15 = vadd.f32 %v3218_v43, %v2822_v0 }
 0x37e   : > { %v2840_v38 = vmax.f32 %v2832_v17, 0.0  ;;  %v2833_v55 = vadd.f32 %v3218_v43, %v2820_v50  ;;  %v3524_v3 = vpop.f32.mrb[52].mxu1 }
 0x37f   : > { %2850 = vst [vmem:[%s5254_s12 + $0x10] sm:$0xff] %v2842_v1  ;;  %v2843_v23 = vmax.f32 %v2835_v15, 0.0  ;;  %v2808_v36 = vadd.f32 %v3524_v3, %v2743_v29  ;;  %v2799_v28 = vpop.f32.mrb[53].mxu1 }
 0x380   : > { %2848 = vst [vmem:[%s5254_s12] sm:$0xff] %v2840_v38  ;;  %v2841_v14 = vmax.f32 %v2833_v55, 0.0  ;;  %v2800_v20 = vadd.f32 %v2799_v28, %v2735_v25  ;;  %v3525_v8 = vpop.f32.mrb[54].mxu1 }
 0x381   : > { %2851 = vst [vmem:[%s5254_s12 + $0x18] sm:$0xff] %v2843_v23  ;;  %v2825_v32 = vmul.f32 %v3217_v19, %v2808_v36  ;;  %v2811_v51 = vadd.f32 %v3525_v8, %v2746_v59  ;;  %v2802_v48 = vpop.f32.mrb[55].mxu1 }
 0x382   : > { %2849 = vst [vmem:[%s5254_s12 + $0x8] sm:$0xff] %v2841_v14  ;;  %v2823_v27 = vmul.f32 %v3217_v19, %v2800_v20  ;;  %v2803_v44 = vadd.f32 %v2802_v48, %v2738_v30 }
 0x383   : > { %v2838_v53 = vadd.f32 %v3218_v43, %v2825_v32  ;;  %v2826_v18 = vmul.f32 %v3217_v19, %v2811_v51 }
 0x384   : > { %v2836_v10 = vadd.f32 %v3218_v43, %v2823_v27  ;;  %v2824_v56 = vmul.f32 %v3217_v19, %v2803_v44 }
 0x385   : > { %v2846_v34 = vmax.f32 %v2838_v53, 0.0  ;;  %v2839_v58 = vadd.f32 %v3218_v43, %v2826_v18 }
 0x386   : > { %v2844_v63 = vmax.f32 %v2836_v10, 0.0  ;;  %v2837_v7 = vadd.f32 %v3218_v43, %v2824_v56 }
 0x387   : > { %2854 = vst [vmem:[%s5254_s12 + $0x30] sm:$0xff] %v2846_v34  ;;  %v2847_v33 = vmax.f32 %v2839_v58, 0.0 }
 0x388   : > { %2852 = vst [vmem:[%s5254_s12 + $0x20] sm:$0xff] %v2844_v63  ;;  %v2845_v16 = vmax.f32 %v2837_v7, 0.0 }
 0x389   : > { %2855 = vst [vmem:[%s5254_s12 + $0x38] sm:$0xff] %v2847_v33 }
 0x38a   : > { %2853 = vst [vmem:[%s5254_s12 + $0x28] sm:$0xff] %v2845_v16 }
 0x38b   : > { %3809 = shalt.err (!%p3806_p2)
}
 0x38c   : > { %s3810_s28 = scalar_lea.hbm %s5266_s24, 1024  ;;  %s3814_s16 = scalar_lea.hbm %s5320_s5, 2048 }
 0x38d   : > { %p3811_p13 = scmp.ne.s32.totalorder %s5266_s24, %s3810_s28  ;;  %p3815_p4 = scmp.lt.u32.totalorder %s5266_s24, %s5320_s5 }
 0x38e   : > { %p3816_p5 = scmp.lt.u32.totalorder %s3814_s16, %s3810_s28  ;;  %p3818_p11 = scmp.lt.u32.totalorder %s3810_s28, %s5266_s24 }
 0x38f   : > { %p3812_p6 = pnand %p3811_p13, %p5348_p0 }
 0x390   : > { %p3817_p8 = por %p3816_p5, %p3815_p4 }
 0x391   : > { %p3813_p10 = pneg %p3812_p6 }
 0x392   : > { %p3819_p1 = por %p3818_p11, %p3817_p8 }
 0x394   : > { %p3820_p3 = pnand %p3819_p1, %p3813_p10 }
 0x396   : > { %3823 = shalt.err (!%p3820_p3)
}
 0x397   : > { %s3878_s13 = smov 128   ;;  %s3879_s7 = smov 8  }
 0x398   : > { %3536 = dma.vmem_to_hbm [thread:$0]  (%p5348_p0), %s5268_s17, 1024, %s5266_s24, %s2857_s22, %s3878_s13, %s3878_s13, %s3879_s7  }
 0x399 PF: > { %s2885_s6 = sand.u32 1, %s3854_s18   ;;  %p5349_p7 = scmp.ne.s32.totalorder %s5328_s25, 0 }
 0x39a   : > { %p5350_p9 = scmp.ge.s32.totalorder %s3866_s21, 2  ;;  %s2886_s26 = scalar_lea.sflag [#allocation8], %s2885_s6 }
 0x39c   : > { %p3550_p12 = pnand %p5350_p9, %p5349_p7 }
 0x39e   : > { %3849 = dma.done.wait (!%p3550_p12), %s2886_s26, 1024  }
 0x39f   : > { %3851 = vsyncadd (!%p3550_p12), %s2886_s26, 4294966272  ;;  %p19_p2 = scmp.ge.s32.totalorder %s4020_s14, 4   ;;  %s5351_s18 = smov %s3858_s19 }
 0x3a0   : > { %s5352_s19 = smov %s3862_s20  ;;  %s5353_s20 = smov %s4036_s27 }
 0x3a1   : > { %s5354_s21 = smov %s4020_s14  ;;  %21 = sbr.rel (!%p19_p2) target bundleno = 6 (0x6), region = 98 }
 0x3a8   :  { %2891 = vsyncpa [#allocation7], 1 }
 0x3a9   :  { %2893 = vsyncpa [#allocation7 + $0x1], 1 }
 0x3aa   :  { %2894 = vsyncpa [#allocation10], 1 }
 0x3ab   :  { %2895 = vsyncpa [#allocation8], 1 }
 0x3ac   :  { %2897 = vsyncpa [#allocation8 + $0x1], 1 }

</bundles_post_ra>
